<compile_context>
chip_gen: v6e
topology: v6e:2x2x1
jax: 0.10.0
libtpu: 0.0.40
codegen_flags: <defaults>
</compile_context>

<pallas_src>
import numpy as np
import jax
import jax.numpy as jnp
from jax import lax
from jax.experimental import pallas as pl
from jax.experimental.pallas import tpu as pltpu

LANE = 128
_TARGET_TILE_ROWS = 512          # up to 512*128 elements / channel / grid step

# spherical-harmonics constants (same as Illumination_layer)
_A0 = np.pi
_A1 = 2.0 * np.pi / np.sqrt(3.0)
_A2 = 2.0 * np.pi / np.sqrt(8.0)
_C0 = 1.0 / np.sqrt(4.0 * np.pi)
_C1 = np.sqrt(3.0) / np.sqrt(4.0 * np.pi)
_C2 = 3.0 * np.sqrt(5.0) / np.sqrt(12.0 * np.pi)
_D0 = 0.5 / np.sqrt(3.0)

# per-basis scale folded into gamma (order matches the reduced basis below)
_SH_SCALE = np.array(
    [
        _A0 * _C0,          # constant term
        -_A1 * _C1,         # * ny
        _A1 * _C1,          # * nz
        -_A1 * _C1,         # * nx
        _A2 * _C2,          # * nx*ny
        -_A2 * _C2,         # * ny*nz
        3.0 * _A2 * _C2 * _D0,   # * nz*nz   (the "-1" goes into the constant)
        -_A2 * _C2,         # * nx*nz
        0.5 * _A2 * _C2,    # * (nx*nx - ny*ny)
    ],
    dtype=np.float32,
)


# ---------------------------------------------------------------- layout glue
def _pick_tile_rows(n, batch):
    """Largest multiple-of-8 row count that divides the padded row total,
    capped at _TARGET_TILE_ROWS; at batch==1 also capped so the R grid axis
    has >= 2 steps (v7x megacore has 2 TensorCores)."""
    n128 = -(-n // LANE)
    r8 = max(8, -(-n128 // 8) * 8)
    limit = min(_TARGET_TILE_ROWS, r8)
    if batch == 1 and r8 >= 16:
        limit = min(limit, r8 // 2)
    limit = max(8, (limit // 8) * 8)
    best = 8
    for rows in range(8, limit + 1, 8):
        if r8 % rows == 0:
            best = rows
    return best


def _fold(x_cm, tile_rows):
    """(B, C, N) -> (B, C, R, 128), zero-padded so R % tile_rows == 0."""
    B, C, N = x_cm.shape
    n128 = -(-N // LANE)
    R = -(-n128 // tile_rows) * tile_rows
    pad = R * LANE - N
    if pad:
        x_cm = jnp.pad(x_cm, ((0, 0), (0, 0), (0, pad)))
    return x_cm.reshape(B, C, R, LANE)


def _unfold(x_f, n):
    B, C, R, L = x_f.shape
    return x_f.reshape(B, C, R * L)[:, :, :n]


# -------------------------------------------------------------------- kernels
def _tri_normal_kernel(v_ref, out_ref):
    """cross((v2-v1),(v3-v1)), then L2-normalize.

    v_ref  : (1, 9, rows, 128)  channels = [v1.xyz | v2.xyz | v3.xyz]
    out_ref: (1, 3, rows, 128)
    """
    v1x, v1y, v1z = v_ref[0, 0, :, :], v_ref[0, 1, :, :], v_ref[0, 2, :, :]
    e1x = v_ref[0, 3, :, :] - v1x
    e1y = v_ref[0, 4, :, :] - v1y
    e1z = v_ref[0, 5, :, :] - v1z
    e2x = v_ref[0, 6, :, :] - v1x
    e2y = v_ref[0, 7, :, :] - v1y
    e2z = v_ref[0, 8, :, :] - v1z
    nx = e1y * e2z - e1z * e2y
    ny = e1z * e2x - e1x * e2z
    nz = e1x * e2y - e1y * e2x
    # matches F.normalize eps clamp (norm clamped at 1e-12); rsqrt -> EUP slot
    inv = lax.rsqrt(jnp.maximum(nx * nx + ny * ny + nz * nz, 1e-24))
    out_ref[0, 0, :, :] = nx * inv
    out_ref[0, 1, :, :] = ny * inv
    out_ref[0, 2, :, :] = nz * inv


def _illum_kernel(gamma_ref, vsum_ref, tex_ref, out_ref):
    """Vertex-normal normalization + SH lighting + texture modulation + clamp.

    gamma_ref : SMEM (B*27,)       SH coeffs with all constants pre-folded
    vsum_ref  : (1, 3, rows, 128)  sum of adjacent tri-normals per vertex
    tex_ref   : (1, 3, rows, 128)  per-vertex texture
    out_ref   : (1, 3, rows, 128)  shaded per-vertex color (clamped to [0,255])
    """
    b = pl.program_id(0)
    nx = vsum_ref[0, 0, :, :]
    ny = vsum_ref[0, 1, :, :]
    nz = vsum_ref[0, 2, :, :]
    # clamp so zero-padded / degenerate lanes never produce inf/NaN
    inv = lax.rsqrt(jnp.maximum(nx * nx + ny * ny + nz * nz, 1e-24))
    nx = nx * inv
    ny = ny * inv
    nz = nz * inv

    # reduced SH basis (all constants live in gamma)
    t_xy = nx * ny
    t_yz = ny * nz
    t_zz = nz * nz
    t_xz = nx * nz
    t_dd = nx * nx - ny * ny

    base = b * 27
    for c in range(3):
        off = base + c * 9
        light = gamma_ref[off + 0] + gamma_ref[off + 1] * ny
        light = light + gamma_ref[off + 2] * nz
        light = light + gamma_ref[off + 3] * nx
        light = light + gamma_ref[off + 4] * t_xy
        light = light + gamma_ref[off + 5] * t_yz
        light = light + gamma_ref[off + 6] * t_zz
        light = light + gamma_ref[off + 7] * t_xz
        light = light + gamma_ref[off + 8] * t_dd
        out_ref[0, c, :, :] = jnp.clip(tex_ref[0, c, :, :] * light, 0.0, 255.0)


# ------------------------------------------------------------------- wrappers
def compute_tri_normals(v9_cm):
    """v9_cm: (B, 9, T) stacked [v1|v2|v3] channel-major
    -> (B, 3, R, 128) folded (padded) triangle normals."""
    B, _, T = v9_cm.shape
    rows = _pick_tile_rows(T, B)
    v9f = _fold(v9_cm, rows)
    R = v9f.shape[2]
    in_spec = pl.BlockSpec((1, 9, rows, LANE), lambda b, t: (b, 0, t, 0))
    out_spec = pl.BlockSpec((1, 3, rows, LANE), lambda b, t: (b, 0, t, 0))
    return pl.pallas_call(
        _tri_normal_kernel,
        out_shape=jax.ShapeDtypeStruct((B, 3, R, LANE), jnp.float32),
        grid=(B, R // rows),
        in_specs=[in_spec],
        out_specs=out_spec,
        compiler_params=pltpu.CompilerParams(
            dimension_semantics=("parallel", "parallel")),
    )(v9f)


def illumination(vsum_cm, tex_cm, gamma_flat):
    """vsum_cm,tex_cm: (B,3,V); gamma_flat: (B*27,) -> (B,3,V) shaded color."""
    B, _, V = vsum_cm.shape
    rows = _pick_tile_rows(V, B)
    vf, tf = _fold(vsum_cm, rows), _fold(tex_cm, rows)
    R = vf.shape[2]
    spec = pl.BlockSpec((1, 3, rows, LANE), lambda b, t: (b, 0, t, 0))
    out = pl.pallas_call(
        _illum_kernel,
        out_shape=jax.ShapeDtypeStruct((B, 3, R, LANE), jnp.float32),
        grid=(B, R // rows),
        in_specs=[
            pl.BlockSpec(memory_space=pltpu.MemorySpace.SMEM),  # gamma scalars
            spec,
            spec,
        ],
        out_specs=spec,
        compiler_params=pltpu.CompilerParams(
            dimension_semantics=("parallel", "parallel")),
    )(gamma_flat, vf, tf)
    return _unfold(out, V)


def render_3dmm_forward(rott_geometry, texture, diffuse_sh, tris, vert_tris):
    """rott_geometry: (B,V,3), texture: (B,V,3), diffuse_sh: (B,27),
    tris: (T,3) int32, vert_tris: (V,K) int32  ->  (B,V,3) shaded colors."""
    B, V, _ = rott_geometry.shape
    geom = rott_geometry.astype(jnp.float32)

    # triangle-vertex gathers stay in XLA, but along the *major* vertex axis of
    # the row-major (B, V, 3) tensor (not the lane axis of a channel-major one)
    v1 = jnp.take(geom, tris[:, 0], axis=1, mode="clip")     # (B, T, 3)
    v2 = jnp.take(geom, tris[:, 1], axis=1, mode="clip")
    v3 = jnp.take(geom, tris[:, 2], axis=1, mode="clip")
    v9_cm = jnp.transpose(jnp.concatenate([v1, v2, v3], axis=2), (0, 2, 1))  # (B,9,T)

    tri_n_f = compute_tri_normals(v9_cm)                     # (B, 3, Rt, 128)
    Tp = tri_n_f.shape[2] * LANE
    # keep the padded length (indices are all < T, so padding is never read)
    tri_n_rm = jnp.transpose(tri_n_f.reshape(B, 3, Tp), (0, 2, 1))  # (B, Tp, 3)

    # K-way adjacency gather along the major axis + sum (XLA fuses the reduce)
    vsum_rm = jnp.take(tri_n_rm, vert_tris, axis=1, mode="clip").sum(axis=2)  # (B,V,3)
    vsum_cm = jnp.transpose(vsum_rm, (0, 2, 1))              # (B, 3, V)
    tex_cm = jnp.transpose(texture.astype(jnp.float32), (0, 2, 1))  # (B, 3, V)

    # fold +0.8 and every SH constant into gamma: the "-1" of (3nz^2-1)
    # becomes an extra constant added to the channel-0 coefficient.
    gamma = diffuse_sh.reshape(B, 3, 9).astype(jnp.float32)
    g = gamma.at[:, :, 0].add(0.8) * jnp.asarray(_SH_SCALE)
    g = g.at[:, :, 0].add(-(_A2 * _C2 * _D0) * gamma[:, :, 6])
    gamma_flat = g.reshape(B * 27)

    face_color_cm = illumination(vsum_cm, tex_cm, gamma_flat)  # (B, 3, V), clamped
    face_color = jnp.transpose(face_color_cm, (0, 2, 1))       # (B, V, 3)

    # TODO(synk): pytorch3d MeshRasterizer + SoftSimpleShader (softmax_rgb_blend)
    # rasterization has no clean Pallas equivalent; the pipeline stops at the
    # per-vertex colors that TexturesVertex would receive (clamp already applied).
    return face_color


# ------------------------------------------------------------------ reference
def _reference(rott_geometry, texture, diffuse_sh, tris, vert_tris):
    """Pure-JAX reference matching the PyTorch math (for sanity checking)."""
    g = rott_geometry
    v1 = g[:, tris[:, 0], :]
    v2 = g[:, tris[:, 1], :]
    v3 = g[:, tris[:, 2], :]
    e1 = v2 - v1
    e2 = v3 - v1
    nn = jnp.stack(
        [
            e1[..., 1] * e2[..., 2] - e1[..., 2] * e2[..., 1],
            e1[..., 2] * e2[..., 0] - e1[..., 0] * e2[..., 2],
            e1[..., 0] * e2[..., 1] - e1[..., 1] * e2[..., 0],
        ],
        axis=-1,
    )
    tri_normal = nn / jnp.maximum(jnp.linalg.norm(nn, axis=2, keepdims=True), 1e-12)
    v_norm = tri_normal[:, vert_tris, :].sum(2)
    vert_normal = v_norm / jnp.linalg.norm(v_norm, axis=2, keepdims=True)
    nx, ny, nz = vert_normal[..., 0], vert_normal[..., 1], vert_normal[..., 2]
    Y = jnp.stack(
        [
            jnp.full_like(nx, _A0 * _C0),
            -_A1 * _C1 * ny,
            _A1 * _C1 * nz,
            -_A1 * _C1 * nx,
            _A2 * _C2 * nx * ny,
            -_A2 * _C2 * ny * nz,
            _A2 * _C2 * _D0 * (3.0 * nz ** 2 - 1.0),
            -_A2 * _C2 * nx * nz,
            _A2 * _C2 * 0.5 * (nx ** 2 - ny ** 2),
        ],
        axis=-1,
    )                                                     # (B, V, 9)
    gamma = diffuse_sh.reshape(-1, 3, 9)
    gamma = gamma.at[:, :, 0].add(0.8)
    gamma = jnp.transpose(gamma, (0, 2, 1))               # (B, 9, 3)
    lighting = jnp.einsum("bvj,bjc->bvc", Y, gamma,
                          precision=jax.lax.Precision.HIGHEST)
    face_color = texture * lighting
    return jnp.clip(face_color, 0.0, 255.0)


if __name__ == "__main__":
    # small-but-representative synthetic topology (stand-in for topology_info.npy)
    B, V, T, K = 2, 6144, 12288, 8
    key = jax.random.PRNGKey(0)
    k1, k2, k3, k4 = jax.random.split(key, 4)

    rott_geometry = jax.random.normal(k1, (B, V, 3), dtype=jnp.float32)
    texture = jax.random.uniform(k2, (B, V, 3), dtype=jnp.float32) * 255.0
    diffuse_sh = jax.random.normal(k3, (B, 27), dtype=jnp.float32) * 0.1

    # guarantee the 3 vertex indices of every triangle are distinct
    base = jax.random.randint(k4, (T,), 0, V, dtype=jnp.int32)
    tris = jnp.stack([base, (base + 1) % V, (base + 2) % V], axis=1)        # (T, 3)
    vert_tris = (
        (jnp.arange(V, dtype=jnp.int32)[:, None] * 7
         + jnp.arange(K, dtype=jnp.int32)[None, :] * 13) % T
    ).astype(jnp.int32)                                                     # (V, K)

    fwd = jax.jit(render_3dmm_forward)
    out = jax.block_until_ready(fwd(rott_geometry, texture, diffuse_sh, tris, vert_tris))

    ref = _reference(rott_geometry, texture, diffuse_sh, tris, vert_tris)
    np.testing.assert_allclose(np.asarray(out), np.asarray(ref), rtol=2e-3, atol=1e-1)

    print("KERNEL_OK")
</pallas_src>

<mosaic_0001>
module attributes {stable_mosaic.version = 11 : i64} {
  func.func @_tri_normal_kernel(%arg0: i32, %arg1: i32, %arg2: memref<1x9x96x128xf32, #tpu.memory_space<vmem>>, %arg3: memref<1x3x96x128xf32, #tpu.memory_space<vmem>>) attributes {dimension_semantics = [#tpu.dimension_semantics<parallel>, #tpu.dimension_semantics<parallel>], iteration_bounds = array<i64: 2, 1>, scalar_prefetch = 0 : i64, scratch_operands = 0 : i64, tpu.core_type = #tpu.core_type<tc>, window_params = [{transform_indices = @transform_0, window_bounds = array<i64: 1, 9, 96, 128>}, {transform_indices = @transform_1, window_bounds = array<i64: 1, 3, 96, 128>}]} {
    %c0 = arith.constant 0 : index
    %c0_0 = arith.constant 0 : index
    %c0_1 = arith.constant 0 : index
    %c0_2 = arith.constant 0 : index
    %0 = vector.load %arg2[%c0, %c0_0, %c0_1, %c0_2] : memref<1x9x96x128xf32, #tpu.memory_space<vmem>>, vector<1x1x96x128xf32>
    %1 = vector.shape_cast %0 : vector<1x1x96x128xf32> to vector<96x128xf32>
    %c0_3 = arith.constant 0 : index
    %c1 = arith.constant 1 : index
    %c0_4 = arith.constant 0 : index
    %c0_5 = arith.constant 0 : index
    %2 = vector.load %arg2[%c0_3, %c1, %c0_4, %c0_5] : memref<1x9x96x128xf32, #tpu.memory_space<vmem>>, vector<1x1x96x128xf32>
    %3 = vector.shape_cast %2 : vector<1x1x96x128xf32> to vector<96x128xf32>
    %c0_6 = arith.constant 0 : index
    %c2 = arith.constant 2 : index
    %c0_7 = arith.constant 0 : index
    %c0_8 = arith.constant 0 : index
    %4 = vector.load %arg2[%c0_6, %c2, %c0_7, %c0_8] : memref<1x9x96x128xf32, #tpu.memory_space<vmem>>, vector<1x1x96x128xf32>
    %5 = vector.shape_cast %4 : vector<1x1x96x128xf32> to vector<96x128xf32>
    %c0_9 = arith.constant 0 : index
    %c3 = arith.constant 3 : index
    %c0_10 = arith.constant 0 : index
    %c0_11 = arith.constant 0 : index
    %6 = vector.load %arg2[%c0_9, %c3, %c0_10, %c0_11] : memref<1x9x96x128xf32, #tpu.memory_space<vmem>>, vector<1x1x96x128xf32>
    %7 = vector.shape_cast %6 : vector<1x1x96x128xf32> to vector<96x128xf32>
    %8 = arith.subf %7, %1 : vector<96x128xf32>
    %c0_12 = arith.constant 0 : index
    %c4 = arith.constant 4 : index
    %c0_13 = arith.constant 0 : index
    %c0_14 = arith.constant 0 : index
    %9 = vector.load %arg2[%c0_12, %c4, %c0_13, %c0_14] : memref<1x9x96x128xf32, #tpu.memory_space<vmem>>, vector<1x1x96x128xf32>
    %10 = vector.shape_cast %9 : vector<1x1x96x128xf32> to vector<96x128xf32>
    %11 = arith.subf %10, %3 : vector<96x128xf32>
    %c0_15 = arith.constant 0 : index
    %c5 = arith.constant 5 : index
    %c0_16 = arith.constant 0 : index
    %c0_17 = arith.constant 0 : index
    %12 = vector.load %arg2[%c0_15, %c5, %c0_16, %c0_17] : memref<1x9x96x128xf32, #tpu.memory_space<vmem>>, vector<1x1x96x128xf32>
    %13 = vector.shape_cast %12 : vector<1x1x96x128xf32> to vector<96x128xf32>
    %14 = arith.subf %13, %5 : vector<96x128xf32>
    %c0_18 = arith.constant 0 : index
    %c6 = arith.constant 6 : index
    %c0_19 = arith.constant 0 : index
    %c0_20 = arith.constant 0 : index
    %15 = vector.load %arg2[%c0_18, %c6, %c0_19, %c0_20] : memref<1x9x96x128xf32, #tpu.memory_space<vmem>>, vector<1x1x96x128xf32>
    %16 = vector.shape_cast %15 : vector<1x1x96x128xf32> to vector<96x128xf32>
    %17 = arith.subf %16, %1 : vector<96x128xf32>
    %c0_21 = arith.constant 0 : index
    %c7 = arith.constant 7 : index
    %c0_22 = arith.constant 0 : index
    %c0_23 = arith.constant 0 : index
    %18 = vector.load %arg2[%c0_21, %c7, %c0_22, %c0_23] : memref<1x9x96x128xf32, #tpu.memory_space<vmem>>, vector<1x1x96x128xf32>
    %19 = vector.shape_cast %18 : vector<1x1x96x128xf32> to vector<96x128xf32>
    %20 = arith.subf %19, %3 : vector<96x128xf32>
    %c0_24 = arith.constant 0 : index
    %c8 = arith.constant 8 : index
    %c0_25 = arith.constant 0 : index
    %c0_26 = arith.constant 0 : index
    %21 = vector.load %arg2[%c0_24, %c8, %c0_25, %c0_26] : memref<1x9x96x128xf32, #tpu.memory_space<vmem>>, vector<1x1x96x128xf32>
    %22 = vector.shape_cast %21 : vector<1x1x96x128xf32> to vector<96x128xf32>
    %23 = arith.subf %22, %5 : vector<96x128xf32>
    %24 = arith.mulf %11, %23 : vector<96x128xf32>
    %25 = arith.mulf %14, %20 : vector<96x128xf32>
    %26 = arith.subf %24, %25 : vector<96x128xf32>
    %27 = arith.mulf %14, %17 : vector<96x128xf32>
    %28 = arith.mulf %8, %23 : vector<96x128xf32>
    %29 = arith.subf %27, %28 : vector<96x128xf32>
    %30 = arith.mulf %8, %20 : vector<96x128xf32>
    %31 = arith.mulf %11, %17 : vector<96x128xf32>
    %32 = arith.subf %30, %31 : vector<96x128xf32>
    %33 = arith.mulf %26, %26 : vector<96x128xf32>
    %34 = arith.mulf %29, %29 : vector<96x128xf32>
    %35 = arith.addf %33, %34 : vector<96x128xf32>
    %36 = arith.mulf %32, %32 : vector<96x128xf32>
    %37 = arith.addf %35, %36 : vector<96x128xf32>
    %cst = arith.constant 1.000000e-24 : f32
    %38 = vector.broadcast %cst : f32 to vector<96x128xf32>
    %39 = arith.maximumf %37, %38 : vector<96x128xf32>
    %40 = math.rsqrt %39 : vector<96x128xf32>
    %41 = arith.mulf %26, %40 : vector<96x128xf32>
    %c0_27 = arith.constant 0 : index
    %c0_28 = arith.constant 0 : index
    %c0_29 = arith.constant 0 : index
    %c0_30 = arith.constant 0 : index
    %42 = vector.load %arg3[%c0_27, %c0_28, %c0_29, %c0_30] : memref<1x3x96x128xf32, #tpu.memory_space<vmem>>, vector<1x1x96x128xf32>
    %43 = vector.shape_cast %42 : vector<1x1x96x128xf32> to vector<96x128xf32>
    %44 = vector.shape_cast %41 : vector<96x128xf32> to vector<1x1x96x128xf32>
    tpu.vector_store %arg3[%c0_27, %c0_28, %c0_29, %c0_30], %44 {strides = array<i32>} : memref<1x3x96x128xf32, #tpu.memory_space<vmem>>, vector<1x1x96x128xf32>,
    %45 = arith.mulf %29, %40 : vector<96x128xf32>
    %c0_31 = arith.constant 0 : index
    %c1_32 = arith.constant 1 : index
    %c0_33 = arith.constant 0 : index
    %c0_34 = arith.constant 0 : index
    %46 = vector.load %arg3[%c0_31, %c1_32, %c0_33, %c0_34] : memref<1x3x96x128xf32, #tpu.memory_space<vmem>>, vector<1x1x96x128xf32>
    %47 = vector.shape_cast %46 : vector<1x1x96x128xf32> to vector<96x128xf32>
    %48 = vector.shape_cast %45 : vector<96x128xf32> to vector<1x1x96x128xf32>
    tpu.vector_store %arg3[%c0_31, %c1_32, %c0_33, %c0_34], %48 {strides = array<i32>} : memref<1x3x96x128xf32, #tpu.memory_space<vmem>>, vector<1x1x96x128xf32>,
    %49 = arith.mulf %32, %40 : vector<96x128xf32>
    %c0_35 = arith.constant 0 : index
    %c2_36 = arith.constant 2 : index
    %c0_37 = arith.constant 0 : index
    %c0_38 = arith.constant 0 : index
    %50 = vector.load %arg3[%c0_35, %c2_36, %c0_37, %c0_38] : memref<1x3x96x128xf32, #tpu.memory_space<vmem>>, vector<1x1x96x128xf32>
    %51 = vector.shape_cast %50 : vector<1x1x96x128xf32> to vector<96x128xf32>
    %52 = vector.shape_cast %49 : vector<96x128xf32> to vector<1x1x96x128xf32>
    tpu.vector_store %arg3[%c0_35, %c2_36, %c0_37, %c0_38], %52 {strides = array<i32>} : memref<1x3x96x128xf32, #tpu.memory_space<vmem>>, vector<1x1x96x128xf32>,
    return
  }
  func.func @transform_0(%arg0: i32, %arg1: i32) -> (i32, i32, i32, i32) {
    %c0_i32 = arith.constant 0 : i32
    %c0_i32_0 = arith.constant 0 : i32
    %c0_i32_1 = arith.constant 0 : i32
    return %arg0, %c0_i32, %arg1, %c0_i32_0 : i32, i32, i32, i32
  }
  func.func @transform_1(%arg0: i32, %arg1: i32) -> (i32, i32, i32, i32) {
    %c0_i32 = arith.constant 0 : i32
    %c0_i32_0 = arith.constant 0 : i32
    %c0_i32_1 = arith.constant 0 : i32
    return %arg0, %c0_i32, %arg1, %c0_i32_0 : i32, i32, i32, i32
  }
}

module attributes {stable_mosaic.version = 11 : i64} {
  func.func @_illum_kernel(%arg0: i32, %arg1: i32, %arg2: memref<54xf32, #tpu.memory_space<smem>>, %arg3: memref<1x3x48x128xf32, #tpu.memory_space<vmem>>, %arg4: memref<1x3x48x128xf32, #tpu.memory_space<vmem>>, %arg5: memref<1x3x48x128xf32, #tpu.memory_space<vmem>>) attributes {dimension_semantics = [#tpu.dimension_semantics<parallel>, #tpu.dimension_semantics<parallel>], iteration_bounds = array<i64: 2, 1>, scalar_prefetch = 0 : i64, scratch_operands = 0 : i64, tpu.core_type = #tpu.core_type<tc>, window_params = [{transform_indices = @transform_0, window_bounds = array<i64: 54>}, {transform_indices = @transform_1, window_bounds = array<i64: 1, 3, 48, 128>}, {transform_indices = @transform_2, window_bounds = array<i64: 1, 3, 48, 128>}, {transform_indices = @transform_3, window_bounds = array<i64: 1, 3, 48, 128>}]} {
    %c0 = arith.constant 0 : index
    %c0_0 = arith.constant 0 : index
    %c0_1 = arith.constant 0 : index
    %c0_2 = arith.constant 0 : index
    %0 = vector.load %arg3[%c0, %c0_0, %c0_1, %c0_2] : memref<1x3x48x128xf32, #tpu.memory_space<vmem>>, vector<1x1x48x128xf32>
    %1 = vector.shape_cast %0 : vector<1x1x48x128xf32> to vector<48x128xf32>
    %c0_3 = arith.constant 0 : index
    %c1 = arith.constant 1 : index
    %c0_4 = arith.constant 0 : index
    %c0_5 = arith.constant 0 : index
    %2 = vector.load %arg3[%c0_3, %c1, %c0_4, %c0_5] : memref<1x3x48x128xf32, #tpu.memory_space<vmem>>, vector<1x1x48x128xf32>
    %3 = vector.shape_cast %2 : vector<1x1x48x128xf32> to vector<48x128xf32>
    %c0_6 = arith.constant 0 : index
    %c2 = arith.constant 2 : index
    %c0_7 = arith.constant 0 : index
    %c0_8 = arith.constant 0 : index
    %4 = vector.load %arg3[%c0_6, %c2, %c0_7, %c0_8] : memref<1x3x48x128xf32, #tpu.memory_space<vmem>>, vector<1x1x48x128xf32>
    %5 = vector.shape_cast %4 : vector<1x1x48x128xf32> to vector<48x128xf32>
    %6 = arith.mulf %1, %1 : vector<48x128xf32>
    %7 = arith.mulf %3, %3 : vector<48x128xf32>
    %8 = arith.addf %6, %7 : vector<48x128xf32>
    %9 = arith.mulf %5, %5 : vector<48x128xf32>
    %10 = arith.addf %8, %9 : vector<48x128xf32>
    %cst = arith.constant 1.000000e-24 : f32
    %11 = vector.broadcast %cst : f32 to vector<48x128xf32>
    %12 = arith.maximumf %10, %11 : vector<48x128xf32>
    %13 = math.rsqrt %12 : vector<48x128xf32>
    %14 = arith.mulf %1, %13 : vector<48x128xf32>
    %15 = arith.mulf %3, %13 : vector<48x128xf32>
    %16 = arith.mulf %5, %13 : vector<48x128xf32>
    %17 = arith.mulf %14, %15 : vector<48x128xf32>
    %18 = arith.mulf %15, %16 : vector<48x128xf32>
    %19 = arith.mulf %16, %16 : vector<48x128xf32>
    %20 = arith.mulf %14, %16 : vector<48x128xf32>
    %21 = arith.mulf %14, %14 : vector<48x128xf32>
    %22 = arith.mulf %15, %15 : vector<48x128xf32>
    %23 = arith.subf %21, %22 : vector<48x128xf32>
    %c27_i32 = arith.constant 27 : i32
    %24 = arith.muli %arg0, %c27_i32 : i32
    %c0_i32 = arith.constant 0 : i32
    %25 = arith.addi %24, %c0_i32 : i32
    %c0_i32_9 = arith.constant 0 : i32
    %26 = arith.addi %25, %c0_i32_9 : i32
    %27 = arith.index_cast %26 : i32 to index
    %28 = memref.load %arg2[%27] : memref<54xf32, #tpu.memory_space<smem>>
    %c1_i32 = arith.constant 1 : i32
    %29 = arith.addi %25, %c1_i32 : i32
    %30 = arith.index_cast %29 : i32 to index
    %31 = memref.load %arg2[%30] : memref<54xf32, #tpu.memory_space<smem>>
    %32 = vector.broadcast %31 : f32 to vector<48x128xf32>
    %33 = arith.mulf %32, %15 : vector<48x128xf32>
    %34 = vector.broadcast %28 : f32 to vector<48x128xf32>
    %35 = arith.addf %34, %33 : vector<48x128xf32>
    %c2_i32 = arith.constant 2 : i32
    %36 = arith.addi %25, %c2_i32 : i32
    %37 = arith.index_cast %36 : i32 to index
    %38 = memref.load %arg2[%37] : memref<54xf32, #tpu.memory_space<smem>>
    %39 = vector.broadcast %38 : f32 to vector<48x128xf32>
    %40 = arith.mulf %39, %16 : vector<48x128xf32>
    %41 = arith.addf %35, %40 : vector<48x128xf32>
    %c3_i32 = arith.constant 3 : i32
    %42 = arith.addi %25, %c3_i32 : i32
    %43 = arith.index_cast %42 : i32 to index
    %44 = memref.load %arg2[%43] : memref<54xf32, #tpu.memory_space<smem>>
    %45 = vector.broadcast %44 : f32 to vector<48x128xf32>
    %46 = arith.mulf %45, %14 : vector<48x128xf32>
    %47 = arith.addf %41, %46 : vector<48x128xf32>
    %c4_i32 = arith.constant 4 : i32
    %48 = arith.addi %25, %c4_i32 : i32
    %49 = arith.index_cast %48 : i32 to index
    %50 = memref.load %arg2[%49] : memref<54xf32, #tpu.memory_space<smem>>
    %51 = vector.broadcast %50 : f32 to vector<48x128xf32>
    %52 = arith.mulf %51, %17 : vector<48x128xf32>
    %53 = arith.addf %47, %52 : vector<48x128xf32>
    %c5_i32 = arith.constant 5 : i32
    %54 = arith.addi %25, %c5_i32 : i32
    %55 = arith.index_cast %54 : i32 to index
    %56 = memref.load %arg2[%55] : memref<54xf32, #tpu.memory_space<smem>>
    %57 = vector.broadcast %56 : f32 to vector<48x128xf32>
    %58 = arith.mulf %57, %18 : vector<48x128xf32>
    %59 = arith.addf %53, %58 : vector<48x128xf32>
    %c6_i32 = arith.constant 6 : i32
    %60 = arith.addi %25, %c6_i32 : i32
    %61 = arith.index_cast %60 : i32 to index
    %62 = memref.load %arg2[%61] : memref<54xf32, #tpu.memory_space<smem>>
    %63 = vector.broadcast %62 : f32 to vector<48x128xf32>
    %64 = arith.mulf %63, %19 : vector<48x128xf32>
    %65 = arith.addf %59, %64 : vector<48x128xf32>
    %c7_i32 = arith.constant 7 : i32
    %66 = arith.addi %25, %c7_i32 : i32
    %67 = arith.index_cast %66 : i32 to index
    %68 = memref.load %arg2[%67] : memref<54xf32, #tpu.memory_space<smem>>
    %69 = vector.broadcast %68 : f32 to vector<48x128xf32>
    %70 = arith.mulf %69, %20 : vector<48x128xf32>
    %71 = arith.addf %65, %70 : vector<48x128xf32>
    %c8_i32 = arith.constant 8 : i32
    %72 = arith.addi %25, %c8_i32 : i32
    %73 = arith.index_cast %72 : i32 to index
    %74 = memref.load %arg2[%73] : memref<54xf32, #tpu.memory_space<smem>>
    %75 = vector.broadcast %74 : f32 to vector<48x128xf32>
    %76 = arith.mulf %75, %23 : vector<48x128xf32>
    %77 = arith.addf %71, %76 : vector<48x128xf32>
    %c0_10 = arith.constant 0 : index
    %c0_11 = arith.constant 0 : index
    %c0_12 = arith.constant 0 : index
    %c0_13 = arith.constant 0 : index
    %78 = vector.load %arg4[%c0_10, %c0_11, %c0_12, %c0_13] : memref<1x3x48x128xf32, #tpu.memory_space<vmem>>, vector<1x1x48x128xf32>
    %79 = vector.shape_cast %78 : vector<1x1x48x128xf32> to vector<48x128xf32>
    %80 = arith.mulf %79, %77 : vector<48x128xf32>
    %cst_14 = arith.constant 0.000000e+00 : f32
    %cst_15 = arith.constant 2.550000e+02 : f32
    %81 = vector.broadcast %cst_14 : f32 to vector<48x128xf32>
    %82 = arith.maximumf %81, %80 : vector<48x128xf32>
    %83 = vector.broadcast %cst_15 : f32 to vector<48x128xf32>
    %84 = arith.minimumf %83, %82 : vector<48x128xf32>
    %c0_16 = arith.constant 0 : index
    %c0_17 = arith.constant 0 : index
    %c0_18 = arith.constant 0 : index
    %c0_19 = arith.constant 0 : index
    %85 = vector.load %arg5[%c0_16, %c0_17, %c0_18, %c0_19] : memref<1x3x48x128xf32, #tpu.memory_space<vmem>>, vector<1x1x48x128xf32>
    %86 = vector.shape_cast %85 : vector<1x1x48x128xf32> to vector<48x128xf32>
    %87 = vector.shape_cast %84 : vector<48x128xf32> to vector<1x1x48x128xf32>
    tpu.vector_store %arg5[%c0_16, %c0_17, %c0_18, %c0_19], %87 {strides = array<i32>} : memref<1x3x48x128xf32, #tpu.memory_space<vmem>>, vector<1x1x48x128xf32>,
    %c9_i32 = arith.constant 9 : i32
    %88 = arith.addi %24, %c9_i32 : i32
    %c0_i32_20 = arith.constant 0 : i32
    %89 = arith.addi %88, %c0_i32_20 : i32
    %90 = arith.index_cast %89 : i32 to index
    %91 = memref.load %arg2[%90] : memref<54xf32, #tpu.memory_space<smem>>
    %c1_i32_21 = arith.constant 1 : i32
    %92 = arith.addi %88, %c1_i32_21 : i32
    %93 = arith.index_cast %92 : i32 to index
    %94 = memref.load %arg2[%93] : memref<54xf32, #tpu.memory_space<smem>>
    %95 = vector.broadcast %94 : f32 to vector<48x128xf32>
    %96 = arith.mulf %95, %15 : vector<48x128xf32>
    %97 = vector.broadcast %91 : f32 to vector<48x128xf32>
    %98 = arith.addf %97, %96 : vector<48x128xf32>
    %c2_i32_22 = arith.constant 2 : i32
    %99 = arith.addi %88, %c2_i32_22 : i32
    %100 = arith.index_cast %99 : i32 to index
    %101 = memref.load %arg2[%100] : memref<54xf32, #tpu.memory_space<smem>>
    %102 = vector.broadcast %101 : f32 to vector<48x128xf32>
    %103 = arith.mulf %102, %16 : vector<48x128xf32>
    %104 = arith.addf %98, %103 : vector<48x128xf32>
    %c3_i32_23 = arith.constant 3 : i32
    %105 = arith.addi %88, %c3_i32_23 : i32
    %106 = arith.index_cast %105 : i32 to index
    %107 = memref.load %arg2[%106] : memref<54xf32, #tpu.memory_space<smem>>
    %108 = vector.broadcast %107 : f32 to vector<48x128xf32>
    %109 = arith.mulf %108, %14 : vector<48x128xf32>
    %110 = arith.addf %104, %109 : vector<48x128xf32>
    %c4_i32_24 = arith.constant 4 : i32
    %111 = arith.addi %88, %c4_i32_24 : i32
    %112 = arith.index_cast %111 : i32 to index
    %113 = memref.load %arg2[%112] : memref<54xf32, #tpu.memory_space<smem>>
    %114 = vector.broadcast %113 : f32 to vector<48x128xf32>
    %115 = arith.mulf %114, %17 : vector<48x128xf32>
    %116 = arith.addf %110, %115 : vector<48x128xf32>
    %c5_i32_25 = arith.constant 5 : i32
    %117 = arith.addi %88, %c5_i32_25 : i32
    %118 = arith.index_cast %117 : i32 to index
    %119 = memref.load %arg2[%118] : memref<54xf32, #tpu.memory_space<smem>>
    %120 = vector.broadcast %119 : f32 to vector<48x128xf32>
    %121 = arith.mulf %120, %18 : vector<48x128xf32>
    %122 = arith.addf %116, %121 : vector<48x128xf32>
    %c6_i32_26 = arith.constant 6 : i32
    %123 = arith.addi %88, %c6_i32_26 : i32
    %124 = arith.index_cast %123 : i32 to index
    %125 = memref.load %arg2[%124] : memref<54xf32, #tpu.memory_space<smem>>
    %126 = vector.broadcast %125 : f32 to vector<48x128xf32>
    %127 = arith.mulf %126, %19 : vector<48x128xf32>
    %128 = arith.addf %122, %127 : vector<48x128xf32>
    %c7_i32_27 = arith.constant 7 : i32
    %129 = arith.addi %88, %c7_i32_27 : i32
    %130 = arith.index_cast %129 : i32 to index
    %131 = memref.load %arg2[%130] : memref<54xf32, #tpu.memory_space<smem>>
    %132 = vector.broadcast %131 : f32 to vector<48x128xf32>
    %133 = arith.mulf %132, %20 : vector<48x128xf32>
    %134 = arith.addf %128, %133 : vector<48x128xf32>
    %c8_i32_28 = arith.constant 8 : i32
    %135 = arith.addi %88, %c8_i32_28 : i32
    %136 = arith.index_cast %135 : i32 to index
    %137 = memref.load %arg2[%136] : memref<54xf32, #tpu.memory_space<smem>>
    %138 = vector.broadcast %137 : f32 to vector<48x128xf32>
    %139 = arith.mulf %138, %23 : vector<48x128xf32>
    %140 = arith.addf %134, %139 : vector<48x128xf32>
    %c0_29 = arith.constant 0 : index
    %c1_30 = arith.constant 1 : index
    %c0_31 = arith.constant 0 : index
    %c0_32 = arith.constant 0 : index
    %141 = vector.load %arg4[%c0_29, %c1_30, %c0_31, %c0_32] : memref<1x3x48x128xf32, #tpu.memory_space<vmem>>, vector<1x1x48x128xf32>
    %142 = vector.shape_cast %141 : vector<1x1x48x128xf32> to vector<48x128xf32>
    %143 = arith.mulf %142, %140 : vector<48x128xf32>
    %cst_33 = arith.constant 0.000000e+00 : f32
    %cst_34 = arith.constant 2.550000e+02 : f32
    %144 = vector.broadcast %cst_33 : f32 to vector<48x128xf32>
    %145 = arith.maximumf %144, %143 : vector<48x128xf32>
    %146 = vector.broadcast %cst_34 : f32 to vector<48x128xf32>
    %147 = arith.minimumf %146, %145 : vector<48x128xf32>
    %c0_35 = arith.constant 0 : index
    %c1_36 = arith.constant 1 : index
    %c0_37 = arith.constant 0 : index
    %c0_38 = arith.constant 0 : index
    %148 = vector.load %arg5[%c0_35, %c1_36, %c0_37, %c0_38] : memref<1x3x48x128xf32, #tpu.memory_space<vmem>>, vector<1x1x48x128xf32>
    %149 = vector.shape_cast %148 : vector<1x1x48x128xf32> to vector<48x128xf32>
    %150 = vector.shape_cast %147 : vector<48x128xf32> to vector<1x1x48x128xf32>
    tpu.vector_store %arg5[%c0_35, %c1_36, %c0_37, %c0_38], %150 {strides = array<i32>} : memref<1x3x48x128xf32, #tpu.memory_space<vmem>>, vector<1x1x48x128xf32>,
    %c18_i32 = arith.constant 18 : i32
    %151 = arith.addi %24, %c18_i32 : i32
    %c0_i32_39 = arith.constant 0 : i32
    %152 = arith.addi %151, %c0_i32_39 : i32
    %153 = arith.index_cast %152 : i32 to index
    %154 = memref.load %arg2[%153] : memref<54xf32, #tpu.memory_space<smem>>
    %c1_i32_40 = arith.constant 1 : i32
    %155 = arith.addi %151, %c1_i32_40 : i32
    %156 = arith.index_cast %155 : i32 to index
    %157 = memref.load %arg2[%156] : memref<54xf32, #tpu.memory_space<smem>>
    %158 = vector.broadcast %157 : f32 to vector<48x128xf32>
    %159 = arith.mulf %158, %15 : vector<48x128xf32>
    %160 = vector.broadcast %154 : f32 to vector<48x128xf32>
    %161 = arith.addf %160, %159 : vector<48x128xf32>
    %c2_i32_41 = arith.constant 2 : i32
    %162 = arith.addi %151, %c2_i32_41 : i32
    %163 = arith.index_cast %162 : i32 to index
    %164 = memref.load %arg2[%163] : memref<54xf32, #tpu.memory_space<smem>>
    %165 = vector.broadcast %164 : f32 to vector<48x128xf32>
    %166 = arith.mulf %165, %16 : vector<48x128xf32>
    %167 = arith.addf %161, %166 : vector<48x128xf32>
    %c3_i32_42 = arith.constant 3 : i32
    %168 = arith.addi %151, %c3_i32_42 : i32
    %169 = arith.index_cast %168 : i32 to index
    %170 = memref.load %arg2[%169] : memref<54xf32, #tpu.memory_space<smem>>
    %171 = vector.broadcast %170 : f32 to vector<48x128xf32>
    %172 = arith.mulf %171, %14 : vector<48x128xf32>
    %173 = arith.addf %167, %172 : vector<48x128xf32>
    %c4_i32_43 = arith.constant 4 : i32
    %174 = arith.addi %151, %c4_i32_43 : i32
    %175 = arith.index_cast %174 : i32 to index
    %176 = memref.load %arg2[%175] : memref<54xf32, #tpu.memory_space<smem>>
    %177 = vector.broadcast %176 : f32 to vector<48x128xf32>
    %178 = arith.mulf %177, %17 : vector<48x128xf32>
    %179 = arith.addf %173, %178 : vector<48x128xf32>
    %c5_i32_44 = arith.constant 5 : i32
    %180 = arith.addi %151, %c5_i32_44 : i32
    %181 = arith.index_cast %180 : i32 to index
    %182 = memref.load %arg2[%181] : memref<54xf32, #tpu.memory_space<smem>>
    %183 = vector.broadcast %182 : f32 to vector<48x128xf32>
    %184 = arith.mulf %183, %18 : vector<48x128xf32>
    %185 = arith.addf %179, %184 : vector<48x128xf32>
    %c6_i32_45 = arith.constant 6 : i32
    %186 = arith.addi %151, %c6_i32_45 : i32
    %187 = arith.index_cast %186 : i32 to index
    %188 = memref.load %arg2[%187] : memref<54xf32, #tpu.memory_space<smem>>
    %189 = vector.broadcast %188 : f32 to vector<48x128xf32>
    %190 = arith.mulf %189, %19 : vector<48x128xf32>
    %191 = arith.addf %185, %190 : vector<48x128xf32>
    %c7_i32_46 = arith.constant 7 : i32
    %192 = arith.addi %151, %c7_i32_46 : i32
    %193 = arith.index_cast %192 : i32 to index
    %194 = memref.load %arg2[%193] : memref<54xf32, #tpu.memory_space<smem>>
    %195 = vector.broadcast %194 : f32 to vector<48x128xf32>
    %196 = arith.mulf %195, %20 : vector<48x128xf32>
    %197 = arith.addf %191, %196 : vector<48x128xf32>
    %c8_i32_47 = arith.constant 8 : i32
    %198 = arith.addi %151, %c8_i32_47 : i32
    %199 = arith.index_cast %198 : i32 to index
    %200 = memref.load %arg2[%199] : memref<54xf32, #tpu.memory_space<smem>>
    %201 = vector.broadcast %200 : f32 to vector<48x128xf32>
    %202 = arith.mulf %201, %23 : vector<48x128xf32>
    %203 = arith.addf %197, %202 : vector<48x128xf32>
    %c0_48 = arith.constant 0 : index
    %c2_49 = arith.constant 2 : index
    %c0_50 = arith.constant 0 : index
    %c0_51 = arith.constant 0 : index
    %204 = vector.load %arg4[%c0_48, %c2_49, %c0_50, %c0_51] : memref<1x3x48x128xf32, #tpu.memory_space<vmem>>, vector<1x1x48x128xf32>
    %205 = vector.shape_cast %204 : vector<1x1x48x128xf32> to vector<48x128xf32>
    %206 = arith.mulf %205, %203 : vector<48x128xf32>
    %cst_52 = arith.constant 0.000000e+00 : f32
    %cst_53 = arith.constant 2.550000e+02 : f32
    %207 = vector.broadcast %cst_52 : f32 to vector<48x128xf32>
    %208 = arith.maximumf %207, %206 : vector<48x128xf32>
    %209 = vector.broadcast %cst_53 : f32 to vector<48x128xf32>
    %210 = arith.minimumf %209, %208 : vector<48x128xf32>
    %c0_54 = arith.constant 0 : index
    %c2_55 = arith.constant 2 : index
    %c0_56 = arith.constant 0 : index
    %c0_57 = arith.constant 0 : index
    %211 = vector.load %arg5[%c0_54, %c2_55, %c0_56, %c0_57] : memref<1x3x48x128xf32, #tpu.memory_space<vmem>>, vector<1x1x48x128xf32>
    %212 = vector.shape_cast %211 : vector<1x1x48x128xf32> to vector<48x128xf32>
    %213 = vector.shape_cast %210 : vector<48x128xf32> to vector<1x1x48x128xf32>
    tpu.vector_store %arg5[%c0_54, %c2_55, %c0_56, %c0_57], %213 {strides = array<i32>} : memref<1x3x48x128xf32, #tpu.memory_space<vmem>>, vector<1x1x48x128xf32>,
    return
  }
  func.func @transform_0(%arg0: i32, %arg1: i32) -> i32 {
    %c0_i32 = arith.constant 0 : i32
    %c0_i32_0 = arith.constant 0 : i32
    return %c0_i32 : i32
  }
  func.func @transform_1(%arg0: i32, %arg1: i32) -> (i32, i32, i32, i32) {
    %c0_i32 = arith.constant 0 : i32
    %c0_i32_0 = arith.constant 0 : i32
    %c0_i32_1 = arith.constant 0 : i32
    return %arg0, %c0_i32, %arg1, %c0_i32_0 : i32, i32, i32, i32
  }
  func.func @transform_2(%arg0: i32, %arg1: i32) -> (i32, i32, i32, i32) {
    %c0_i32 = arith.constant 0 : i32
    %c0_i32_0 = arith.constant 0 : i32
    %c0_i32_1 = arith.constant 0 : i32
    return %arg0, %c0_i32, %arg1, %c0_i32_0 : i32, i32, i32, i32
  }
  func.func @transform_3(%arg0: i32, %arg1: i32) -> (i32, i32, i32, i32) {
    %c0_i32 = arith.constant 0 : i32
    %c0_i32_0 = arith.constant 0 : i32
    %c0_i32_1 = arith.constant 0 : i32
    return %arg0, %c0_i32, %arg1, %c0_i32_0 : i32, i32, i32, i32
  }
}

</mosaic_0001>

<bundles_post_ra>
// kernel: render_3dmm_forward.2
= control target key start
LH: loop header
LB: loop body
LE: loop exit
PB: predicated region body
PF: predicated region fallthrough
CT: control target
= control target key end

     0   :  { %s910_s6 = smov 0   ;;  %s912_s7 = smov 0   ;;  %s1305_s0 = inlined_call_operand.vmem [shape: f32[2,9,96,128], index: 0, kind: input, shape index: {}]   ;;  %s1306_s1 = inlined_call_operand.vmem [shape: f32[2,3,96,128], index: 1, kind: output, shape index: {}]  }
   0x1   :  { %s914_s8 = smov 0  }
   0x2 LB: > { %s23_s9 = sadd.s32 1, %s894_s7  ;;  %p701_p0 = scmp.ge.s32.totalorder %s898_s8, 1  ;;  %s898_s8 = sphi %s914_s8, %s11_s8   ;;  %s894_s7 = sphi %s912_s7, %s1308_s7   ;;  %s890_s6 = sphi %s910_s6, %s1307_s6  }
   0x3   : > { %p25_p1 = scmp.ge.s32.totalorder %s23_s9, 2  ;;  %p108_p2 = scmp.lt.s32.totalorder %s898_s8, 3 }
   0x5   : > { %s1310_s9 = smov (%p25_p1, %s23_s9), 0  ;;  %p109_p3 = pnand %p701_p0, %p108_p2 }
   0x6   : > { %p137_p4 = scmp.lt.s32.totalorder (!%p109_p3), %s890_s6, 1 }
   0x7   : > { %112 = sbr.rel (%p109_p3) target bundleno = 114 (0x72), region = 24 }
   0xc   : > { %s1312_s6 = smov (!%p137_p4, %s890_s6), 1 }
   0xd   : > { %s826_s10 = smul.u32 864, %s1312_s6 }
   0xe   : > { %s827_s14 = smul.u32 288, %s1312_s6 }
   0xf   : > { %s934_s13 = scalar_lea.vmem %s1305_s0, %s826_s10 }
  0x10   : > { %v156_v0 = vld [vmem:[%s934_s13] sm:$0xff]  ;;  %v157_v15 = vld [vmem:[%s934_s13 + $0x8] sm:$0xff]  ;;  %v158_v32 = vld [vmem:[%s934_s13 + $0x10] sm:$0xff]  ;;  %s1052_s17 = scalar_lea.vmem %s1306_s1, %s827_s14 }
  0x11   : > { %v704_v1 = vld [vmem:[%s934_s13 + $0x60] sm:$0xff]  ;;  %v705_v16 = vld [vmem:[%s934_s13 + $0x68] sm:$0xff]  ;;  %v706_v37 = vld [vmem:[%s934_s13 + $0x70] sm:$0xff] }
  0x12   : > { %v716_v2 = vld [vmem:[%s934_s13 + $0xc0] sm:$0xff]  ;;  %v717_v17 = vld [vmem:[%s934_s13 + $0xc8] sm:$0xff]  ;;  %v730_v38 = vld [vmem:[%s934_s13 + $0x130] sm:$0xff] }
  0x13   : > { %v728_v3 = vld [vmem:[%s934_s13 + $0x120] sm:$0xff]  ;;  %v729_v18 = vld [vmem:[%s934_s13 + $0x128] sm:$0xff]  ;;  %v718_v42 = vld [vmem:[%s934_s13 + $0xd0] sm:$0xff]  ;;  %v209_v43 = vsub.f32 %v730_v38, %v158_v32 }
  0x14   : > { %v740_v4 = vld [vmem:[%s934_s13 + $0x180] sm:$0xff]  ;;  %v207_v6 = vsub.f32 %v728_v3, %v156_v0  ;;  %v741_v19 = vld [vmem:[%s934_s13 + $0x188] sm:$0xff]  ;;  %v208_v30 = vsub.f32 %v729_v18, %v157_v15  ;;  %v742_v44 = vld [vmem:[%s934_s13 + $0x190] sm:$0xff] }
  0x15   : > { %v752_v5 = vld [vmem:[%s934_s13 + $0x1e0] sm:$0xff]  ;;  %v232_v7 = vsub.f32 %v740_v4, %v704_v1  ;;  %v753_v20 = vld [vmem:[%s934_s13 + $0x1e8] sm:$0xff]  ;;  %v233_v31 = vsub.f32 %v741_v19, %v705_v16  ;;  %v754_v45 = vld [vmem:[%s934_s13 + $0x1f0] sm:$0xff]  ;;  %v234_v61 = vsub.f32 %v742_v44, %v706_v37 }
  0x16   : > { %v257_v8 = vsub.f32 %v752_v5, %v716_v2  ;;  %v764_v9 = vld [vmem:[%s934_s13 + $0x240] sm:$0xff]  ;;  %v765_v25 = vld [vmem:[%s934_s13 + $0x248] sm:$0xff]  ;;  %v258_v35 = vsub.f32 %v753_v20, %v717_v17  ;;  %v766_v50 = vld [vmem:[%s934_s13 + $0x250] sm:$0xff]  ;;  %v259_v62 = vsub.f32 %v754_v45, %v718_v42 }
  0x17   : > { %v776_v10 = vld [vmem:[%s934_s13 + $0x2a0] sm:$0xff]  ;;  %v282_v12 = vsub.f32 %v764_v9, %v156_v0  ;;  %v777_v26 = vld [vmem:[%s934_s13 + $0x2a8] sm:$0xff]  ;;  %v283_v36 = vsub.f32 %v765_v25, %v157_v15  ;;  %v778_v51 = vld [vmem:[%s934_s13 + $0x2b0] sm:$0xff] }
  0x18   : > { %v788_v11 = vld [vmem:[%s934_s13 + $0x300] sm:$0xff]  ;;  %v307_v13 = vsub.f32 %v776_v10, %v704_v1  ;;  %v789_v27 = vld [vmem:[%s934_s13 + $0x308] sm:$0xff]  ;;  %v308_v40 = vsub.f32 %v777_v26, %v705_v16  ;;  %v790_v56 = vld [vmem:[%s934_s13 + $0x310] sm:$0xff]  ;;  %v284_v1 = vsub.f32 %v766_v50, %v158_v32 }
  0x19   : > { %v332_v14 = vsub.f32 %v788_v11, %v716_v2  ;;  %v380_v23 = vmul.f32 %v282_v12, %v257_v8  ;;  %v428_v29 = vmul.f32 %v282_v12, %v232_v7  ;;  %v333_v41 = vsub.f32 %v789_v27, %v717_v17  ;;  %v159_v57 = vld [vmem:[%s934_s13 + $0x18] sm:$0xff]  ;;  %v160_v26 = vld [vmem:[%s934_s13 + $0x20] sm:$0xff] }
  0x1a   : > { %v356_v22 = vmul.f32 %v307_v13, %v257_v8  ;;  %v416_v28 = vmul.f32 %v307_v13, %v207_v6  ;;  %v381_v48 = vmul.f32 %v283_v36, %v258_v35  ;;  %v429_v49 = vmul.f32 %v283_v36, %v233_v31  ;;  %v731_v58 = vld [vmem:[%s934_s13 + $0x138] sm:$0xff]  ;;  %v732_v27 = vld [vmem:[%s934_s13 + $0x140] sm:$0xff] }
  0x1b   : > { %v344_v21 = vmul.f32 %v332_v14, %v232_v7  ;;  %v392_v24 = vmul.f32 %v332_v14, %v207_v6  ;;  %v345_v53 = vmul.f32 %v333_v41, %v233_v31  ;;  %v357_v54 = vmul.f32 %v308_v40, %v258_v35  ;;  %v707_v6 = vld [vmem:[%s934_s13 + $0x78] sm:$0xff]  ;;  %v744_v44 = vld [vmem:[%s934_s13 + $0x1a0] sm:$0xff] }
  0x1c   : > { %v961_v39 = vsub.f32 %v416_v28, %v428_v29  ;;  %v393_v55 = vmul.f32 %v333_v41, %v208_v30  ;;  %v417_v60 = vmul.f32 %v308_v40, %v208_v30  ;;  %v309_v2 = vsub.f32 %v778_v51, %v706_v37  ;;  %v743_v8 = vld [vmem:[%s934_s13 + $0x198] sm:$0xff]  ;;  %v708_v37 = vld [vmem:[%s934_s13 + $0x80] sm:$0xff] }
  0x1d   : > { %v955_v33 = vsub.f32 %v344_v21, %v356_v22  ;;  %v957_v34 = vsub.f32 %v380_v23, %v392_v24  ;;  %v977_v63 = vsub.f32 %v345_v53, %v357_v54  ;;  %v334_v5 = vsub.f32 %v790_v56, %v718_v42  ;;  %v719_v13 = vld [vmem:[%s934_s13 + $0xd8] sm:$0xff]  ;;  %v720_v42 = vld [vmem:[%s934_s13 + $0xe0] sm:$0xff] }
  0x1e   : > { %v488_v52 = vmul.f32 %v961_v39, %v961_v39  ;;  %v979_v0 = vsub.f32 %v381_v48, %v393_v55  ;;  %v981_v4 = vsub.f32 %v417_v60, %v429_v49  ;;  %v210_v7 = vsub.f32 %v731_v58, %v159_v57  ;;  %v755_v14 = vld [vmem:[%s934_s13 + $0x1f8] sm:$0xff]  ;;  %v756_v45 = vld [vmem:[%s934_s13 + $0x200] sm:$0xff]  ;;  %v733_v58 = vld [vmem:[%s934_s13 + $0x148] sm:$0xff] }
  0x1f   : > { %v452_v46 = vmul.f32 %v955_v33, %v955_v33  ;;  %v464_v47 = vmul.f32 %v957_v34, %v957_v34  ;;  %v453_v9 = vmul.f32 %v977_v63, %v977_v63  ;;  %v358_v11 = vmul.f32 %v309_v2, %v259_v62  ;;  %v767_v19 = vld [vmem:[%s934_s13 + $0x258] sm:$0xff]  ;;  %v768_v50 = vld [vmem:[%s934_s13 + $0x260] sm:$0xff] }
  0x20   : > { %v465_v10 = vmul.f32 %v979_v0, %v979_v0  ;;  %v382_v12 = vmul.f32 %v284_v1, %v259_v62  ;;  %v489_v16 = vmul.f32 %v981_v4, %v981_v4  ;;  %v346_v17 = vmul.f32 %v334_v5, %v234_v61  ;;  %v779_v20 = vld [vmem:[%s934_s13 + $0x2b8] sm:$0xff]  ;;  %v780_v51 = vld [vmem:[%s934_s13 + $0x2c0] sm:$0xff] }
  0x21   : > { %v476_v59 = vadd.f32 %v464_v47, %v452_v46  ;;  %v394_v18 = vmul.f32 %v334_v5, %v209_v43  ;;  %v418_v22 = vmul.f32 %v309_v2, %v209_v43  ;;  %v430_v23 = vmul.f32 %v284_v1, %v234_v61  ;;  %v791_v25 = vld [vmem:[%s934_s13 + $0x318] sm:$0xff]  ;;  %v792_v56 = vld [vmem:[%s934_s13 + $0x320] sm:$0xff] }
  0x22   : > { %v477_v21 = vadd.f32 %v465_v10, %v453_v9  ;;  %v235_v24 = vsub.f32 %v743_v8, %v707_v6  ;;  %v998_v28 = vsub.f32 %v346_v17, %v358_v11  ;;  %v260_v30 = vsub.f32 %v755_v14, %v719_v13  ;;  %v709_v8 = vld [vmem:[%s934_s13 + $0x88] sm:$0xff] }
  0x23   : > { %v500_v3 = vadd.f32 %v488_v52, %v476_v59  ;;  %v1000_v29 = vsub.f32 %v382_v12, %v394_v18  ;;  %v1002_v32 = vsub.f32 %v418_v22, %v430_v23  ;;  %v285_v35 = vsub.f32 %v767_v19, %v159_v57  ;;  %v161_v57 = vld [vmem:[%s934_s13 + $0x28] sm:$0xff] }
  0x24   : > { %v501_v31 = vadd.f32 %v489_v16, %v477_v21  ;;  %v310_v36 = vsub.f32 %v779_v20, %v707_v6  ;;  %v454_v38 = vmul.f32 %v998_v28, %v998_v28  ;;  %v335_v41 = vsub.f32 %v791_v25, %v719_v13  ;;  %v721_v14 = vld [vmem:[%s934_s13 + $0xe8] sm:$0xff] }
  0x25   : > { %v512_v15 = vmax.f32 %v500_v3, 1e-24  ;;  %v466_v40 = vmul.f32 %v1000_v29, %v1000_v29  ;;  %v211_v43 = vsub.f32 %v732_v27, %v160_v26  ;;  %v490_v47 = vmul.f32 %v1002_v32, %v1002_v32  ;;  %v757_v16 = vld [vmem:[%s934_s13 + $0x208] sm:$0xff]  ;;  %v162_v27 = vld [vmem:[%s934_s13 + $0x30] sm:$0xff] }
  0x26   : > { %v513_v46 = vmax.f32 %v501_v31, 1e-24  ;;  %v359_v48 = vmul.f32 %v310_v36, %v260_v30  ;;  %v383_v49 = vmul.f32 %v285_v35, %v260_v30  ;;  %v347_v53 = vmul.f32 %v335_v41, %v235_v24  ;;  %v769_v21 = vld [vmem:[%s934_s13 + $0x268] sm:$0xff]  ;;  %v734_v30 = vld [vmem:[%s934_s13 + $0x150] sm:$0xff] }
  0x27   : > { %852 = vrsqrt.f32 %v512_v15  ;;  %v478_v52 = vadd.f32 %v466_v40, %v454_v38  ;;  %v395_v54 = vmul.f32 %v335_v41, %v210_v7  ;;  %v419_v55 = vmul.f32 %v310_v36, %v210_v7  ;;  %v745_v15 = vld [vmem:[%s934_s13 + $0x1a8] sm:$0xff] }
  0x28   : > { %854 = vrsqrt.f32 %v513_v46  ;;  %v431_v59 = vmul.f32 %v285_v35, %v235_v24  ;;  %v236_v60 = vsub.f32 %v744_v44, %v708_v37  ;;  %v261_v61 = vsub.f32 %v756_v45, %v720_v42  ;;  %v781_v22 = vld [vmem:[%s934_s13 + $0x2c8] sm:$0xff] }
  0x29   : > { %v502_v62 = vadd.f32 %v490_v47, %v478_v52  ;;  %v1019_v1 = vsub.f32 %v347_v53, %v359_v48  ;;  %v1021_v2 = vsub.f32 %v383_v49, %v395_v54  ;;  %v286_v3 = vsub.f32 %v768_v50, %v160_v26  ;;  %v793_v26 = vld [vmem:[%s934_s13 + $0x328] sm:$0xff]  ;;  %v710_v47 = vld [vmem:[%s934_s13 + $0x90] sm:$0xff] }
  0x2a   : > { %v1023_v5 = vsub.f32 %v419_v55, %v431_v59  ;;  %v311_v6 = vsub.f32 %v780_v51, %v708_v37  ;;  %v336_v7 = vsub.f32 %v792_v56, %v720_v42  ;;  %v212_v9 = vsub.f32 %v733_v58, %v161_v57  ;;  %v746_v49 = vld [vmem:[%s934_s13 + $0x1b0] sm:$0xff] }
  0x2b   : > { %v514_v10 = vmax.f32 %v502_v62, 1e-24  ;;  %v455_v11 = vmul.f32 %v1019_v1, %v1019_v1  ;;  %v467_v12 = vmul.f32 %v1021_v2, %v1021_v2  ;;  %v384_v13 = vmul.f32 %v286_v3, %v261_v61  ;;  %v722_v54 = vld [vmem:[%s934_s13 + $0xf0] sm:$0xff] }
  0x2c   : > { %v491_v17 = vmul.f32 %v1023_v5, %v1023_v5  ;;  %v348_v18 = vmul.f32 %v336_v7, %v236_v60  ;;  %v360_v19 = vmul.f32 %v311_v6, %v261_v61  ;;  %v396_v20 = vmul.f32 %v336_v7, %v211_v43  ;;  %v758_v55 = vld [vmem:[%s934_s13 + $0x210] sm:$0xff] }
  0x2d   : > { %856 = vrsqrt.f32 %v514_v10  ;;  %v479_v23 = vadd.f32 %v467_v12, %v455_v11  ;;  %v420_v24 = vmul.f32 %v311_v6, %v211_v43  ;;  %v432_v25 = vmul.f32 %v286_v3, %v236_v60  ;;  %v770_v60 = vld [vmem:[%s934_s13 + $0x270] sm:$0xff] }
  0x2e   : > { %v1041_v31 = vsub.f32 %v348_v18, %v360_v19  ;;  %v1043_v35 = vsub.f32 %v384_v13, %v396_v20  ;;  %v237_v36 = vsub.f32 %v745_v15, %v709_v8  ;;  %v262_v37 = vsub.f32 %v757_v16, %v721_v14  ;;  %v782_v61 = vld [vmem:[%s934_s13 + $0x2d0] sm:$0xff]  ;;  %v163_v16 = vld [vmem:[%s934_s13 + $0x38] sm:$0xff] }
  0x2f   : > { %v503_v38 = vadd.f32 %v491_v17, %v479_v23  ;;  %v1045_v40 = vsub.f32 %v420_v24, %v432_v25  ;;  %v287_v41 = vsub.f32 %v769_v21, %v161_v57  ;;  %v312_v42 = vsub.f32 %v781_v22, %v709_v8  ;;  %v794_v62 = vld [vmem:[%s934_s13 + $0x330] sm:$0xff]  ;;  %v711_v21 = vld [vmem:[%s934_s13 + $0x98] sm:$0xff] }
  0x30   : > { %v456_v44 = vmul.f32 %v1041_v31, %v1041_v31  ;;  %v468_v45 = vmul.f32 %v1043_v35, %v1043_v35  ;;  %v337_v46 = vsub.f32 %v793_v26, %v721_v14  ;;  %v213_v48 = vsub.f32 %v734_v30, %v162_v27  ;;  %v735_v22 = vld [vmem:[%s934_s13 + $0x158] sm:$0xff] }
  0x31   : > { %v515_v51 = vmax.f32 %v503_v38, 1e-24  ;;  %v492_v52 = vmul.f32 %v1045_v40, %v1045_v40  ;;  %v361_v53 = vmul.f32 %v312_v42, %v262_v37  ;;  %v385_v58 = vmul.f32 %v287_v41, %v262_v37  ;;  %v747_v23 = vld [vmem:[%s934_s13 + $0x1b8] sm:$0xff] }
  0x32   : > { %v480_v56 = vadd.f32 %v468_v45, %v456_v44  ;;  %v349_v57 = vmul.f32 %v337_v46, %v237_v36  ;;  %v397_v59 = vmul.f32 %v337_v46, %v212_v9  ;;  %v421_v3 = vmul.f32 %v312_v42, %v212_v9  ;;  %v723_v30 = vld [vmem:[%s934_s13 + $0xf8] sm:$0xff] }
  0x33   : > { %858 = vrsqrt.f32 %v515_v51  ;;  %v433_v6 = vmul.f32 %v287_v41, %v237_v36  ;;  %v263_v11 = vsub.f32 %v758_v55, %v722_v54  ;;  %v288_v14 = vsub.f32 %v770_v60, %v162_v27  ;;  %v771_v36 = vld [vmem:[%s934_s13 + $0x278] sm:$0xff]  ;;  %v724_v60 = vld [vmem:[%s934_s13 + $0x100] sm:$0xff] }
  0x34   : > { %v1047_v43 = vpop.eup %852  ;;  %v504_v7 = vadd.f32 %v492_v52, %v480_v56  ;;  %v1070_v8 = vsub.f32 %v349_v57, %v361_v53  ;;  %v1072_v10 = vsub.f32 %v385_v58, %v397_v59  ;;  %v313_v15 = vsub.f32 %v782_v61, %v710_v47  ;;  %v783_v42 = vld [vmem:[%s934_s13 + $0x2d8] sm:$0xff]  ;;  %v164_v58 = vld [vmem:[%s934_s13 + $0x40] sm:$0xff] }
  0x35   : > { %v536_v50 = vmul.f32 %v1047_v43, %v955_v33  ;;  %v238_v33 = vsub.f32 %v746_v49, %v710_v47  ;;  %v1074_v12 = vpop.eup %854  ;;  %v1076_v13 = vsub.f32 %v421_v3, %v433_v6  ;;  %v338_v9 = vsub.f32 %v794_v62, %v722_v54  ;;  %v795_v49 = vld [vmem:[%s934_s13 + $0x338] sm:$0xff]  ;;  %v712_v59 = vld [vmem:[%s934_s13 + $0xa0] sm:$0xff] }
  0x36   : > { %v537_v17 = vmul.f32 %v1074_v12, %v977_v63  ;;  %v516_v18 = vmax.f32 %v504_v7, 1e-24  ;;  %v457_v19 = vmul.f32 %v1070_v8, %v1070_v8  ;;  %v469_v20 = vmul.f32 %v1072_v10, %v1072_v10  ;;  %v759_v63 = vld [vmem:[%s934_s13 + $0x218] sm:$0xff]  ;;  %v760_v7 = vld [vmem:[%s934_s13 + $0x220] sm:$0xff] }
  0x37   : > { %548 = vst [vmem:[%s1052_s17] sm:$0xff] %v536_v50  ;;  %v493_v24 = vmul.f32 %v1076_v13, %v1076_v13  ;;  %v350_v25 = vmul.f32 %v338_v9, %v238_v33  ;;  %v362_v26 = vmul.f32 %v313_v15, %v263_v11  ;;  %v386_v27 = vmul.f32 %v288_v14, %v263_v11 }
  0x38   : > { %549 = vst [vmem:[%s1052_s17 + $0x8] sm:$0xff] %v537_v17  ;;  %860 = vrsqrt.f32 %v516_v18  ;;  %v481_v37 = vadd.f32 %v469_v20, %v457_v19  ;;  %v398_v38 = vmul.f32 %v338_v9, %v213_v48  ;;  %v422_v41 = vmul.f32 %v313_v15, %v213_v48  ;;  %v784_v20 = vld [vmem:[%s934_s13 + $0x2e0] sm:$0xff] }
  0x39   : > { %v1095_v44 = vsub.f32 %v350_v25, %v362_v26  ;;  %v434_v45 = vmul.f32 %v288_v14, %v238_v33  ;;  %v214_v46 = vsub.f32 %v735_v22, %v163_v16  ;;  %v239_v47 = vsub.f32 %v747_v23, %v711_v21  ;;  %v736_v33 = vld [vmem:[%s934_s13 + $0x160] sm:$0xff] }
  0x3a   : > { %v1098_v50 = vpop.eup %856  ;;  %v505_v51 = vadd.f32 %v493_v24, %v481_v37  ;;  %v1100_v52 = vsub.f32 %v386_v27, %v398_v38  ;;  %v264_v53 = vsub.f32 %v759_v63, %v723_v30  ;;  %v289_v48 = vsub.f32 %v771_v36, %v163_v16  ;;  %v772_v16 = vld [vmem:[%s934_s13 + $0x280] sm:$0xff] }
  0x3b   : > { %v538_v54 = vmul.f32 %v1098_v50, %v998_v28  ;;  %v1104_v55 = vsub.f32 %v422_v41, %v434_v45  ;;  %v458_v56 = vmul.f32 %v1095_v44, %v1095_v44  ;;  %v314_v57 = vsub.f32 %v783_v42, %v711_v21  ;;  %v748_v28 = vld [vmem:[%s934_s13 + $0x1c0] sm:$0xff]  ;;  %v165_v45 = vld [vmem:[%s934_s13 + $0x48] sm:$0xff] }
  0x3c   : > { %v517_v61 = vmax.f32 %v505_v51, 1e-24  ;;  %v470_v62 = vmul.f32 %v1100_v52, %v1100_v52  ;;  %v339_v3 = vsub.f32 %v795_v49, %v723_v30  ;;  %v387_v6 = vmul.f32 %v289_v48, %v264_v53  ;;  %v796_v21 = vld [vmem:[%s934_s13 + $0x340] sm:$0xff] }
  0x3d   : > { %550 = vst [vmem:[%s1052_s17 + $0x10] sm:$0xff] %v538_v54  ;;  %v494_v11 = vmul.f32 %v1104_v55, %v1104_v55  ;;  %v363_v14 = vmul.f32 %v314_v57, %v264_v53  ;;  %v423_v15 = vmul.f32 %v314_v57, %v214_v46  ;;  %v435_v9 = vmul.f32 %v289_v48, %v239_v47  ;;  %v749_v54 = vld [vmem:[%s934_s13 + $0x1c8] sm:$0xff] }
  0x3e   : > { %862 = vrsqrt.f32 %v517_v61  ;;  %v482_v17 = vadd.f32 %v470_v62, %v458_v56  ;;  %v351_v18 = vmul.f32 %v339_v3, %v239_v47  ;;  %v399_v19 = vmul.f32 %v339_v3, %v214_v46  ;;  %v713_v46 = vld [vmem:[%s934_s13 + $0xa8] sm:$0xff] }
  0x3f   : > { %v1122_v22 = vsub.f32 %v423_v15, %v435_v9  ;;  %v215_v23 = vsub.f32 %v736_v33, %v164_v58  ;;  %v240_v24 = vsub.f32 %v748_v28, %v712_v59  ;;  %v265_v25 = vsub.f32 %v760_v7, %v724_v60  ;;  %v737_v47 = vld [vmem:[%s934_s13 + $0x168] sm:$0xff] }
  0x40   : > { %v1124_v26 = vpop.eup %858  ;;  %v506_v27 = vadd.f32 %v494_v11, %v482_v17  ;;  %v1126_v30 = vsub.f32 %v351_v18, %v363_v14  ;;  %v1128_v63 = vsub.f32 %v387_v6, %v399_v19  ;;  %v290_v36 = vsub.f32 %v772_v16, %v164_v58  ;;  %v761_v56 = vld [vmem:[%s934_s13 + $0x228] sm:$0xff] }
  0x41   : > { %v539_v37 = vmul.f32 %v1124_v26, %v1019_v1  ;;  %v495_v38 = vmul.f32 %v1122_v22, %v1122_v22  ;;  %v315_v41 = vsub.f32 %v784_v20, %v712_v59  ;;  %v340_v42 = vsub.f32 %v796_v21, %v724_v60  ;;  %v725_v1 = vld [vmem:[%s934_s13 + $0x108] sm:$0xff]  ;;  %v166_v20 = vld [vmem:[%s934_s13 + $0x50] sm:$0xff] }
  0x42   : > { %v518_v49 = vmax.f32 %v506_v27, 1e-24  ;;  %v459_v51 = vmul.f32 %v1126_v30, %v1126_v30  ;;  %v471_v53 = vmul.f32 %v1128_v63, %v1128_v63  ;;  %v388_v48 = vmul.f32 %v290_v36, %v265_v25  ;;  %v773_v61 = vld [vmem:[%s934_s13 + $0x288] sm:$0xff]  ;;  %v714_v27 = vld [vmem:[%s934_s13 + $0xb0] sm:$0xff] }
  0x43   : > { %551 = vst [vmem:[%s1052_s17 + $0x18] sm:$0xff] %v539_v37  ;;  %v352_v57 = vmul.f32 %v340_v42, %v240_v24  ;;  %v364_v58 = vmul.f32 %v315_v41, %v265_v25  ;;  %v400_v59 = vmul.f32 %v340_v42, %v215_v23  ;;  %v424_v60 = vmul.f32 %v315_v41, %v215_v23  ;;  %v785_v33 = vld [vmem:[%s934_s13 + $0x2e8] sm:$0xff] }
  0x44   : > { %864 = vrsqrt.f32 %v518_v49  ;;  %v483_v62 = vadd.f32 %v471_v53, %v459_v51  ;;  %v436_v3 = vmul.f32 %v290_v36, %v240_v24  ;;  %v216_v6 = vsub.f32 %v737_v47, %v165_v45  ;;  %v797_v28 = vld [vmem:[%s934_s13 + $0x348] sm:$0xff]  ;;  %v738_v36 = vld [vmem:[%s934_s13 + $0x170] sm:$0xff] }
  0x45   : > { %v1148_v7 = vpop.eup %860  ;;  %v1150_v11 = vsub.f32 %v352_v57, %v364_v58  ;;  %v1152_v14 = vsub.f32 %v388_v48, %v400_v59  ;;  %v241_v15 = vsub.f32 %v749_v54, %v713_v46  ;;  %v266_v9 = vsub.f32 %v761_v56, %v725_v1  ;;  %v762_v47 = vld [vmem:[%s934_s13 + $0x230] sm:$0xff] }
  0x46   : > { %v540_v16 = vmul.f32 %v1148_v7, %v1041_v31  ;;  %v507_v17 = vadd.f32 %v495_v38, %v483_v62  ;;  %v1156_v18 = vsub.f32 %v424_v60, %v436_v3  ;;  %v291_v19 = vsub.f32 %v773_v61, %v165_v45  ;;  %v750_v31 = vld [vmem:[%s934_s13 + $0x1d0] sm:$0xff] }
  0x47   : > { %v460_v21 = vmul.f32 %v1150_v11, %v1150_v11  ;;  %v472_v23 = vmul.f32 %v1152_v14, %v1152_v14  ;;  %v316_v24 = vsub.f32 %v785_v33, %v713_v46  ;;  %v341_v25 = vsub.f32 %v797_v28, %v725_v1  ;;  %v726_v45 = vld [vmem:[%s934_s13 + $0x110] sm:$0xff] }
  0x48   : > { %552 = vst [vmem:[%s1052_s17 + $0x20] sm:$0xff] %v540_v16  ;;  %v519_v37 = vmax.f32 %v507_v17, 1e-24  ;;  %v496_v38 = vmul.f32 %v1156_v18, %v1156_v18  ;;  %v389_v41 = vmul.f32 %v291_v19, %v266_v9  ;;  %v437_v42 = vmul.f32 %v291_v19, %v241_v15  ;;  %v774_v48 = vld [vmem:[%s934_s13 + $0x290] sm:$0xff]  ;;  %v715_v16 = vld [vmem:[%s934_s13 + $0xb8] sm:$0xff] }
  0x49   : > { %v484_v49 = vadd.f32 %v472_v23, %v460_v21  ;;  %v353_v51 = vmul.f32 %v341_v25, %v241_v15  ;;  %v365_v53 = vmul.f32 %v316_v24, %v266_v9  ;;  %v401_v46 = vmul.f32 %v341_v25, %v216_v6  ;;  %v786_v1 = vld [vmem:[%s934_s13 + $0x2f0] sm:$0xff]  ;;  %v167_v9 = vld [vmem:[%s934_s13 + $0x58] sm:$0xff] }
  0x4a   : > { %866 = vrsqrt.f32 %v519_v37  ;;  %v425_v54 = vmul.f32 %v316_v24, %v216_v6  ;;  %v217_v56 = vsub.f32 %v738_v36, %v166_v20  ;;  %v242_v57 = vsub.f32 %v750_v31, %v714_v27  ;;  %v798_v58 = vld [vmem:[%s934_s13 + $0x350] sm:$0xff]  ;;  %v727_v17 = vld [vmem:[%s934_s13 + $0x118] sm:$0xff] }
  0x4b   : > { %v1174_v59 = vpop.eup %862  ;;  %v508_v60 = vadd.f32 %v496_v38, %v484_v49  ;;  %v1176_v61 = vsub.f32 %v353_v51, %v365_v53  ;;  %v1178_v62 = vsub.f32 %v389_v41, %v401_v46  ;;  %v267_v3 = vsub.f32 %v762_v47, %v726_v45  ;;  %v739_v25 = vld [vmem:[%s934_s13 + $0x178] sm:$0xff] }
  0x4c   : > { %v541_v33 = vmul.f32 %v1174_v59, %v1070_v8  ;;  %v1182_v28 = vsub.f32 %v425_v54, %v437_v42  ;;  %v292_v6 = vsub.f32 %v774_v48, %v166_v20  ;;  %v317_v15 = vsub.f32 %v786_v1, %v714_v27  ;;  %v751_v8 = vld [vmem:[%s934_s13 + $0x1d8] sm:$0xff] }
  0x4d   : > { %v520_v19 = vmax.f32 %v508_v60, 1e-24  ;;  %v461_v21 = vmul.f32 %v1176_v61, %v1176_v61  ;;  %v473_v23 = vmul.f32 %v1178_v62, %v1178_v62  ;;  %v342_v24 = vsub.f32 %v798_v58, %v726_v45  ;;  %v763_v36 = vld [vmem:[%s934_s13 + $0x238] sm:$0xff] }
  0x4e   : > { %553 = vst [vmem:[%s1052_s17 + $0x28] sm:$0xff] %v541_v33  ;;  %v497_v20 = vmul.f32 %v1182_v28, %v1182_v28  ;;  %v366_v27 = vmul.f32 %v317_v15, %v267_v3  ;;  %v390_v31 = vmul.f32 %v292_v6, %v267_v3  ;;  %v426_v37 = vmul.f32 %v317_v15, %v217_v56  ;;  %v775_v38 = vld [vmem:[%s934_s13 + $0x298] sm:$0xff] }
  0x4f   : > { %868 = vrsqrt.f32 %v520_v19  ;;  %v485_v41 = vadd.f32 %v473_v23, %v461_v21  ;;  %v354_v42 = vmul.f32 %v342_v24, %v242_v57  ;;  %v402_v47 = vmul.f32 %v342_v24, %v217_v56  ;;  %v787_v49 = vld [vmem:[%s934_s13 + $0x2f8] sm:$0xff] }
  0x50   : > { %v799_v51 = vld [vmem:[%s934_s13 + $0x358] sm:$0xff]  ;;  %v438_v53 = vmul.f32 %v292_v6, %v242_v57  ;;  %v218_v46 = vsub.f32 %v739_v25, %v167_v9  ;;  %v243_v45 = vsub.f32 %v751_v8, %v715_v16  ;;  %v268_v48 = vsub.f32 %v763_v36, %v727_v17 }
  0x51   : > { %v865_v1 = vpop.eup %864  ;;  %v509_v54 = vadd.f32 %v497_v20, %v485_v41  ;;  %v1200_v58 = vsub.f32 %v354_v42, %v366_v27  ;;  %v1202_v60 = vsub.f32 %v390_v31, %v402_v47  ;;  %v293_v3 = vsub.f32 %v775_v38, %v167_v9 }
  0x52   : > { %v542_v33 = vmul.f32 %v865_v1, %v1095_v44  ;;  %v1205_v15 = vsub.f32 %v426_v37, %v438_v53  ;;  %v318_v19 = vsub.f32 %v787_v49, %v715_v16  ;;  %v343_v56 = vsub.f32 %v799_v51, %v727_v17 }
  0x53   : > { %v521_v21 = vmax.f32 %v509_v54, 1e-24  ;;  %v462_v57 = vmul.f32 %v1200_v58, %v1200_v58  ;;  %v474_v6 = vmul.f32 %v1202_v60, %v1202_v60  ;;  %v391_v23 = vmul.f32 %v293_v3, %v268_v48 }
  0x54   : > { %554 = vst [vmem:[%s1052_s17 + $0x30] sm:$0xff] %v542_v33  ;;  %v498_v24 = vmul.f32 %v1205_v15, %v1205_v15  ;;  %v355_v25 = vmul.f32 %v343_v56, %v243_v45  ;;  %v367_v9 = vmul.f32 %v318_v19, %v268_v48  ;;  %v403_v8 = vmul.f32 %v343_v56, %v218_v46 }
  0x55   : > { %870 = vrsqrt.f32 %v521_v21  ;;  %v486_v44 = vadd.f32 %v474_v6, %v462_v57  ;;  %v427_v16 = vmul.f32 %v318_v19, %v218_v46  ;;  %v439_v17 = vmul.f32 %v293_v3, %v243_v45 }
  0x56   : > { %v1214_v36 = vsub.f32 %v355_v25, %v367_v9  ;;  %v1216_v20 = vsub.f32 %v391_v23, %v403_v8  ;;  %v560_v27 = vmul.f32 %v1047_v43, %v957_v34  ;;  %v561_v31 = vmul.f32 %v1074_v12, %v979_v0 }
  0x57   : > { %v867_v37 = vpop.eup %866  ;;  %v510_v38 = vadd.f32 %v498_v24, %v486_v44  ;;  %v1222_v41 = vsub.f32 %v427_v16, %v439_v17  ;;  %v562_v42 = vmul.f32 %v1098_v50, %v1000_v29  ;;  %v563_v47 = vmul.f32 %v1124_v26, %v1021_v2 }
  0x58   : > { %v543_v49 = vmul.f32 %v867_v37, %v1126_v30  ;;  %v463_v34 = vmul.f32 %v1214_v36, %v1214_v36  ;;  %v475_v0 = vmul.f32 %v1216_v20, %v1216_v20  ;;  %800 = vst [vmem:[%s1052_s17 + $0x60] sm:$0xff] %v560_v27  ;;  %801 = vst [vmem:[%s1052_s17 + $0x68] sm:$0xff] %v561_v31 }
  0x59   : > { %v564_v51 = vmul.f32 %v1148_v7, %v1043_v35  ;;  %v522_v29 = vmax.f32 %v510_v38, 1e-24  ;;  %v499_v53 = vmul.f32 %v1222_v41, %v1222_v41  ;;  %802 = vst [vmem:[%s1052_s17 + $0x70] sm:$0xff] %v562_v42  ;;  %803 = vst [vmem:[%s1052_s17 + $0x78] sm:$0xff] %v563_v47  ;;  %v565_v2 = vmul.f32 %v1174_v59, %v1072_v10 }
  0x5a   : > { %v566_v30 = vmul.f32 %v865_v1, %v1100_v52  ;;  %555 = vst [vmem:[%s1052_s17 + $0x38] sm:$0xff] %v543_v49  ;;  %v487_v46 = vadd.f32 %v475_v0, %v463_v34  ;;  %v567_v45 = vmul.f32 %v867_v37, %v1128_v63  ;;  %v585_v35 = vmul.f32 %v1047_v43, %v961_v39 }
  0x5b   : > { %804 = vst [vmem:[%s1052_s17 + $0x80] sm:$0xff] %v564_v51  ;;  %v586_v48 = vmul.f32 %v1074_v12, %v981_v4  ;;  %872 = vrsqrt.f32 %v522_v29  ;;  %805 = vst [vmem:[%s1052_s17 + $0x88] sm:$0xff] %v565_v2  ;;  %v587_v10 = vmul.f32 %v1098_v50, %v1002_v32  ;;  %v588_v52 = vmul.f32 %v1124_v26, %v1023_v5 }
  0x5c   : > { %806 = vst [vmem:[%s1052_s17 + $0x90] sm:$0xff] %v566_v30  ;;  %v589_v63 = vmul.f32 %v1148_v7, %v1045_v40  ;;  %v869_v39 = vpop.eup %868  ;;  %v511_v43 = vadd.f32 %v499_v53, %v487_v46  ;;  %807 = vst [vmem:[%s1052_s17 + $0x98] sm:$0xff] %v567_v45  ;;  %v590_v4 = vmul.f32 %v1174_v59, %v1076_v13 }
  0x5d   : > { %812 = vst [vmem:[%s1052_s17 + $0xc0] sm:$0xff] %v585_v35  ;;  %813 = vst [vmem:[%s1052_s17 + $0xc8] sm:$0xff] %v586_v48  ;;  %v591_v32 = vmul.f32 %v865_v1, %v1104_v55  ;;  %v592_v5 = vmul.f32 %v867_v37, %v1122_v22  ;;  %v544_v40 = vmul.f32 %v869_v39, %v1150_v11 }
  0x5e   : > { %v568_v12 = vmul.f32 %v869_v39, %v1152_v14  ;;  %814 = vst [vmem:[%s1052_s17 + $0xd0] sm:$0xff] %v587_v10  ;;  %815 = vst [vmem:[%s1052_s17 + $0xd8] sm:$0xff] %v588_v52  ;;  %v593_v50 = vmul.f32 %v869_v39, %v1156_v18  ;;  %v523_v26 = vmax.f32 %v511_v43, 1e-24 }
  0x5f   : > { %816 = vst [vmem:[%s1052_s17 + $0xe0] sm:$0xff] %v589_v63  ;;  %817 = vst [vmem:[%s1052_s17 + $0xe8] sm:$0xff] %v590_v4 }
  0x60   : > { %818 = vst [vmem:[%s1052_s17 + $0xf0] sm:$0xff] %v591_v32  ;;  %819 = vst [vmem:[%s1052_s17 + $0xf8] sm:$0xff] %v592_v5  ;;  %874 = vrsqrt.f32 %v523_v26 }
  0x61   : > { %556 = vst [vmem:[%s1052_s17 + $0x40] sm:$0xff] %v544_v40  ;;  %808 = vst [vmem:[%s1052_s17 + $0xa0] sm:$0xff] %v568_v12 }
  0x62   : > { %820 = vst [vmem:[%s1052_s17 + $0x100] sm:$0xff] %v593_v50  ;;  %v871_v13 = vpop.eup %870 }
  0x63   : > { %v545_v55 = vmul.f32 %v871_v13, %v1176_v61  ;;  %v569_v22 = vmul.f32 %v871_v13, %v1178_v62  ;;  %v594_v7 = vmul.f32 %v871_v13, %v1182_v28 }
  0x65   : > { %557 = vst [vmem:[%s1052_s17 + $0x48] sm:$0xff] %v545_v55  ;;  %809 = vst [vmem:[%s1052_s17 + $0xa8] sm:$0xff] %v569_v22 }
  0x66   : > { %821 = vst [vmem:[%s1052_s17 + $0x108] sm:$0xff] %v594_v7 }
  0x68   : > { %v873_v11 = vpop.eup %872 }
  0x69   : > { %v546_v14 = vmul.f32 %v873_v11, %v1200_v58  ;;  %v570_v18 = vmul.f32 %v873_v11, %v1202_v60  ;;  %v595_v59 = vmul.f32 %v873_v11, %v1205_v15 }
  0x6b   : > { %558 = vst [vmem:[%s1052_s17 + $0x50] sm:$0xff] %v546_v14  ;;  %810 = vst [vmem:[%s1052_s17 + $0xb0] sm:$0xff] %v570_v18 }
  0x6c   : > { %822 = vst [vmem:[%s1052_s17 + $0x110] sm:$0xff] %v595_v59 }
  0x6d   : > { %v875_v61 = vpop.eup %874 }
  0x6e   : > { %v547_v62 = vmul.f32 %v875_v61, %v1214_v36  ;;  %v571_v28 = vmul.f32 %v875_v61, %v1216_v20  ;;  %v596_v1 = vmul.f32 %v875_v61, %v1222_v41 }
  0x70   : > { %559 = vst [vmem:[%s1052_s17 + $0x58] sm:$0xff] %v547_v62  ;;  %811 = vst [vmem:[%s1052_s17 + $0xb8] sm:$0xff] %v571_v28 }
  0x71   : > { %823 = vst [vmem:[%s1052_s17 + $0x118] sm:$0xff] %v596_v1 }
  0x72 PF: > { %s11_s8 = sadd.s32 1, %s898_s8   ;;  %s1307_s6 = smov %s894_s7 }
  0x73   : > { %p8_p5 = scmp.ge.s32.totalorder %s11_s8, 4   ;;  %s1308_s7 = smov %s1310_s9 }
  0x75   :  { %10 = sbr.rel (!%p8_p5) target bundleno = 2 (0x2), region = 64 }

// kernel: render_3dmm_forward.3
= control target key start
LH: loop header
LB: loop body
LE: loop exit
PB: predicated region body
PF: predicated region fallthrough
CT: control target
= control target key end

     0   :  { %s1979_s0 = inlined_call_operand.vmem [shape: f32[54], index: 0, kind: input, shape index: {}]   ;;  %s1980_s1 = inlined_call_operand.vmem [shape: f32[2,3,48,128], index: 1, kind: input, shape index: {}]   ;;  %s1981_s2 = inlined_call_operand.vmem [shape: f32[2,3,48,128], index: 2, kind: input, shape index: {}]   ;;  %s1982_s3 = inlined_call_operand.vmem [shape: f32[2,3,48,128], index: 3, kind: output, shape index: {}]  }
   0x1   :  { %2038 = sst [smem:[#allocation39_spill]] %s1979_s0 }
   0x2   :  { %2039 = sst [smem:[#allocation40_spill]] %s1980_s1 }
   0x3   :  { %8 = vsyncpa [#allocation3], 0  ;;  %s1122_s12 = smov 0   ;;  %s1124_s13 = smov 0  }
   0x4   :  { %s1126_s14 = smov 0  }
   0x5 LB: > { %s962_s15 = sadd.s32 4294967295, %s1099_s14   ;;  %s26_s16 = sadd.s32 1, %s1095_s13  ;;  %s1099_s14 = sphi %s1126_s14, %s14_s14   ;;  %s1095_s13 = sphi %s1124_s13, %s2125_s13   ;;  %s1091_s12 = sphi %s1122_s12, %s2124_s12  }
   0x6   : > { %p28_p0 = scmp.ge.s32.totalorder %s26_s16, 2  ;;  %p964_p1 = scmp.ge.s32.totalorder %s1099_s14, 1 }
   0x7   : > { %p136_p2 = scmp.lt.s32.totalorder %s1099_s14, 3  ;;  %p1147_p4 = scmp.eq.s32.totalorder %s962_s15, 0 }
   0x8   : > { %s2127_s16 = smov (%p28_p0, %s26_s16), 0  ;;  %s2042_s0 = sld [smem:[#allocation39_spill]] }
   0x9   : > { %p1143_p3 = pnand %p964_p1, %p136_p2 }
   0xb   : > { %p1015_p5 = pneg %p1143_p3 }
   0xd   : > { %p1016_p6 = pnand %p1147_p4, %p1015_p5 }
   0xe   : > { %s149_s21 = sshll.u32 %s2042_s0, 4  ;;  %s150_s21 = int_to_ptr.vmem [resolvable:$true] %s149_s21 }
   0xf   : > { %s1058_s22 = scalar_lea.vmem %s150_s21, 16  ;;  %p1060_p8 = pneg %p1016_p6 }
  0x10   : > { %p1059_p7 = scmp.ne.s32.totalorder %s150_s21, %s1058_s22  ;;  %p1066_p11 = scmp.lt.s32.totalorder %s150_s21, %s150_s21 }
  0x11   : > { %p1067_p12 = scmp.lt.s32.totalorder %s1058_s22, %s1058_s22 }
  0x12   : > { %p1061_p9 = pnand %p1060_p8, %p1059_p7 }
  0x13   : > { %p1068_p13 = por %p1067_p12, %p1066_p11 }
  0x14   : > { %p1062_p10 = pneg %p1061_p9 }
  0x16   : > { %p1069_p0 = pnand %p1068_p13, %p1062_p10 }
  0x18   : > { %1072 = shalt.err (!%p1069_p0)
}
  0x19   : > { %s1101_s23 = smov [#allocation2]   ;;  %188 = sbr.rel (%p1143_p3) target bundleno = 182 (0xb6), region = 32 }
  0x1a   : > { %1018 = dma.vmem_to_smem (!%p1016_p6), %s150_s21, 16, %s1101_s23, [#allocation3]  }
  0x1e   : > { %1086 = dma.done.wait (%p1147_p4), [#allocation3], 16  }
  0x1f   : > { %1088 = vsyncadd (%p1147_p4), [#allocation3], 4294967280 }
  0x20   : > { %194 = sfence }
  0x21   : > { %p231_p1 = scmp.lt.s32.totalorder %s1091_s12, 1  ;;  %s1166_s24 = smul.u32 27, %s1091_s12 }
  0x22   : > { %s2043_s1 = sld [smem:[#allocation40_spill]] }
  0x23   : > { %s2129_s12 = smov (!%p231_p1, %s1091_s12), 1  ;;  %s384_s25 = sadd.s32 1, %s1166_s24 }
  0x24   : > { %s1170_s26 = smul.u32 144, %s2129_s12  ;;  %s1173_s27 = sld [smem:[#allocation2 + %s1166_s24]] }
  0x25   : > { %s400_s28 = sadd.s32 2, %s1166_s24  ;;  %s415_s29 = sadd.s32 3, %s1166_s24 }
  0x26   : > { %s1183_s6 = sld [smem:[#allocation2 + %s384_s25]]  ;;  %s430_s9 = sadd.s32 4, %s1166_s24 }
  0x27   : > { %s1194_s7 = sld [smem:[#allocation2 + %s400_s28]]  ;;  %s445_s11 = sadd.s32 5, %s1166_s24 }
  0x28   : > { %s1181_s5 = scalar_lea.vmem %s2043_s1, %s1170_s26  ;;  %s1202_s8 = sld [smem:[#allocation2 + %s415_s29]] }
  0x29   : > { %v1186_v0 = vld [vmem:[%s1181_s5] sm:$0xff]  ;;  %v1189_v1 = vld [vmem:[%s1181_s5 + $0x30] sm:$0xff]  ;;  %v1206_v6 = vld [vmem:[%s1181_s5 + $0x8] sm:$0xff]  ;;  %s1211_s10 = sld [smem:[#allocation2 + %s430_s9]]  ;;  %s460_s15 = sadd.s32 6, %s1166_s24 }
  0x2a   : > { %v1192_v2 = vld [vmem:[%s1181_s5 + $0x60] sm:$0xff]  ;;  %v280_v3 = vmul.f32 %v1186_v0, %v1186_v0  ;;  %v286_v4 = vmul.f32 %v1189_v1, %v1189_v1  ;;  %v1209_v7 = vld [vmem:[%s1181_s5 + $0x38] sm:$0xff]  ;;  %v1215_v8 = vld [vmem:[%s1181_s5 + $0x68] sm:$0xff]  ;;  %v281_v9 = vmul.f32 %v1206_v6, %v1206_v6  ;;  %s1224_s12 = sld [smem:[#allocation2 + %s445_s11]]  ;;  %s475_s18 = sadd.s32 7, %s1166_s24  ;;  %v1320_v53 = vstv %s1173_s27 }
  0x2b   : > { %v298_v5 = vmul.f32 %v1192_v2, %v1192_v2  ;;  %v287_v10 = vmul.f32 %v1209_v7, %v1209_v7  ;;  %v1222_v11 = vld [vmem:[%s1181_s5 + $0x10] sm:$0xff]  ;;  %v299_v13 = vmul.f32 %v1215_v8, %v1215_v8  ;;  %v1230_v14 = vld [vmem:[%s1181_s5 + $0x40] sm:$0xff]  ;;  %s1237_s17 = sld [smem:[#allocation2 + %s460_s15]]  ;;  %v1243_v19 = vld [vmem:[%s1181_s5 + $0x18] sm:$0xff]  ;;  %s490_s20 = sadd.s32 8, %s1166_s24 }
  0x2c   : > { %v292_v12 = vadd.f32 %v286_v4, %v280_v3  ;;  %v1233_v15 = vld [vmem:[%s1181_s5 + $0x70] sm:$0xff]  ;;  %v282_v16 = vmul.f32 %v1222_v11, %v1222_v11  ;;  %v288_v18 = vmul.f32 %v1230_v14, %v1230_v14  ;;  %v1246_v20 = vld [vmem:[%s1181_s5 + $0x48] sm:$0xff]  ;;  %v1249_v21 = vld [vmem:[%s1181_s5 + $0x78] sm:$0xff]  ;;  %s1251_s19 = sld [smem:[#allocation2 + %s475_s18]]  ;;  %v283_v24 = vmul.f32 %v1243_v19, %v1243_v19  ;;  %s535_s22 = sadd.s32 9, %s1166_s24 }
  0x2d   : > { %v293_v17 = vadd.f32 %v287_v10, %v281_v9  ;;  %v300_v23 = vmul.f32 %v1233_v15, %v1233_v15  ;;  %v289_v25 = vmul.f32 %v1246_v20, %v1246_v20  ;;  %v1261_v26 = vld [vmem:[%s1181_s5 + $0x20] sm:$0xff]  ;;  %v1264_v27 = vld [vmem:[%s1181_s5 + $0x50] sm:$0xff]  ;;  %s1266_s21 = sld [smem:[#allocation2 + %s490_s20]]  ;;  %v301_v34 = vmul.f32 %v1249_v21, %v1249_v21  ;;  %v1279_v36 = vld [vmem:[%s1181_s5 + $0x28] sm:$0xff]  ;;  %s537_s25 = sadd.s32 10, %s1166_s24 }
  0x2e   : > { %v304_v22 = vadd.f32 %v298_v5, %v292_v12  ;;  %v294_v29 = vadd.f32 %v288_v18, %v282_v16  ;;  %v1269_v30 = vld [vmem:[%s1181_s5 + $0x80] sm:$0xff]  ;;  %v284_v31 = vmul.f32 %v1261_v26, %v1261_v26  ;;  %v290_v35 = vmul.f32 %v1264_v27, %v1264_v27  ;;  %s1281_s23 = sld [smem:[#allocation2 + %s535_s22]]  ;;  %v1286_v39 = vld [vmem:[%s1181_s5 + $0x58] sm:$0xff]  ;;  %s553_s28 = sadd.s32 11, %s1166_s24  ;;  %v1291_v42 = vld [vmem:[%s1181_s5 + $0x88] sm:$0xff] }
  0x2f   : > { %v305_v28 = vadd.f32 %v299_v13, %v293_v17  ;;  %v295_v33 = vadd.f32 %v289_v25, %v283_v24  ;;  %v302_v38 = vmul.f32 %v1269_v30, %v1269_v30  ;;  %s1293_s29 = sld [smem:[#allocation2 + %s537_s25]]  ;;  %s568_s30 = sadd.s32 12, %s1166_s24  ;;  %v285_v43 = vmul.f32 %v1279_v36, %v1279_v36 }
  0x30   : > { %v310_v32 = vmax.f32 %v304_v22, 1e-24  ;;  %v306_v40 = vadd.f32 %v300_v23, %v294_v29  ;;  %v296_v41 = vadd.f32 %v290_v35, %v284_v31  ;;  %s1298_s4 = sld [smem:[#allocation2 + %s553_s28]]  ;;  %s583_s9 = sadd.s32 13, %s1166_s24  ;;  %v291_v45 = vmul.f32 %v1286_v39, %v1286_v39 }
  0x31   : > { %v311_v37 = vmax.f32 %v305_v28, 1e-24  ;;  %v307_v44 = vadd.f32 %v301_v34, %v295_v33  ;;  %s1303_s11 = sld [smem:[#allocation2 + %s568_s30]]  ;;  %s598_s5 = sadd.s32 14, %s1166_s24  ;;  %v303_v47 = vmul.f32 %v1291_v42, %v1291_v42  ;;  %v1323_v55 = vstv %s1183_s6 }
  0x32   : > { %1046 = vrsqrt.f32 %v310_v32  ;;  %v308_v46 = vadd.f32 %v302_v38, %v296_v41  ;;  %s1308_s15 = sld [smem:[#allocation2 + %s583_s9]]  ;;  %s613_s18 = sadd.s32 15, %s1166_s24  ;;  %v312_v48 = vmax.f32 %v306_v40, 1e-24  ;;  %v297_v49 = vadd.f32 %v291_v45, %v285_v43 }
  0x33   : > { %1048 = vrsqrt.f32 %v311_v37  ;;  %s1311_s20 = sld [smem:[#allocation2 + %s598_s5]]  ;;  %s628_s22 = sadd.s32 16, %s1166_s24  ;;  %v313_v50 = vmax.f32 %v307_v44, 1e-24  ;;  %v1326_v56 = vstv %s1194_s7  ;;  %v1329_v57 = vstv %s1202_s8 }
  0x34   : > { %s1314_s25 = sld [smem:[#allocation2 + %s613_s18]]  ;;  %s643_s28 = sadd.s32 17, %s1166_s24  ;;  %v309_v51 = vadd.f32 %v303_v47, %v297_v49  ;;  %v314_v52 = vmax.f32 %v308_v46, 1e-24  ;;  %1050 = vrsqrt.f32 %v312_v48  ;;  %v1332_v58 = vstv %s1211_s10 }
  0x35   : > { %s629_s30 = sld [smem:[#allocation2 + %s628_s22]]  ;;  %s690_s9 = sadd.s32 18, %s1166_s24  ;;  %v1335_v59 = vstv %s1224_s12  ;;  %v1338_v60 = vstv %s1237_s17  ;;  %v1341_v61 = vstv %s1251_s19  ;;  %1052 = vrsqrt.f32 %v313_v50 }
  0x36   : > { %s644_s0 = sld [smem:[#allocation2 + %s643_s28]]  ;;  %s692_s1 = sadd.s32 19, %s1166_s24  ;;  %v315_v54 = vmax.f32 %v309_v51, 1e-24  ;;  %v1344_v62 = vstv %s1266_s21  ;;  %1054 = vrsqrt.f32 %v314_v52  ;;  %v1347_v63 = vstv %s1293_s29 }
  0x37   : > { %s691_s5 = sld [smem:[#allocation2 + %s690_s9]]  ;;  %v1350_v3 = vstv %s1281_s23  ;;  %v1353_v4 = vstv %s1298_s4  ;;  %v1356_v5 = vstv %s1303_s11  ;;  %s1519_s27 = scalar_lea.vmem %s1981_s2, %s1170_s26 }
  0x38   : > { %s693_s18 = sld [smem:[#allocation2 + %s692_s1]]  ;;  %1056 = vrsqrt.f32 %v315_v54  ;;  %v1359_v9 = vstv %s1308_s15  ;;  %s1581_s8 = scalar_lea.vmem %s1982_s3, %s1170_s26 }
  0x39   : > { %v1362_v12 = vstv %s1311_s20  ;;  %s708_s26 = sadd.s32 20, %s1166_s24  ;;  %s723_s10 = sadd.s32 21, %s1166_s24 }
  0x3a   : > { %v1365_v13 = vstv %s1314_s25  ;;  %s738_s12 = sadd.s32 22, %s1166_s24  ;;  %s1780_s17 = sld [smem:[#allocation2 + %s708_s26]] }
  0x3b   : > { %v1367_v16 = vstv %s629_s30  ;;  %s753_s19 = sadd.s32 23, %s1166_s24  ;;  %s1788_s21 = sld [smem:[#allocation2 + %s723_s10]] }
  0x3c   : > { %2044 = vst [vmem:[#allocation5_spill] sm:$0xff] %v1367_v16  ;;  %v1369_v17 = vstv %s644_s0  ;;  %s768_s23 = sadd.s32 24, %s1166_s24  ;;  %s1794_s29 = sld [smem:[#allocation2 + %s738_s12]] }
  0x3d   : > { %2045 = vst [vmem:[#allocation6_spill] sm:$0xff] %v1369_v17  ;;  %v1380_v25 = vstv %s691_s5  ;;  %s783_s4 = sadd.s32 25, %s1166_s24  ;;  %s1801_s11 = sld [smem:[#allocation2 + %s753_s19]] }
  0x3e   : > { %2049 = vst [vmem:[#allocation10_spill] sm:$0xff] %v1380_v25  ;;  %v1391_v32 = vstv %s693_s18  ;;  %s798_s15 = sadd.s32 26, %s1166_s24  ;;  %s1809_s20 = sld [smem:[#allocation2 + %s768_s23]] }
  0x3f   : > { %v1047_v10 = vpop.eup %1046  ;;  %2053 = vst [vmem:[#allocation14_spill] sm:$0xff] %v1391_v32  ;;  %s1814_s24 = sld [smem:[#allocation2 + %s783_s4]] }
  0x40   : > { %v1049_v18 = vpop.eup %1048  ;;  %v1372_v22 = vmul.f32 %v1047_v10, %v1186_v0  ;;  %v1375_v23 = vmul.f32 %v1047_v10, %v1189_v1  ;;  %v1378_v24 = vmul.f32 %v1047_v10, %v1192_v2  ;;  %s1820_s22 = sld [smem:[#allocation2 + %s798_s15]] }
  0x41   : > { %v1383_v28 = vmul.f32 %v1049_v18, %v1206_v6  ;;  %v1386_v29 = vmul.f32 %v1049_v18, %v1209_v7  ;;  %v1389_v31 = vmul.f32 %v1049_v18, %v1215_v8  ;;  %v1051_v50 = vpop.eup %1050 }
  0x42   : > { %2046 = vst [vmem:[#allocation7_spill] sm:$0xff] %v1372_v22  ;;  %2047 = vst [vmem:[#allocation8_spill] sm:$0xff] %v1375_v23  ;;  %v1395_v0 = vmul.f32 %v1375_v23, %v1372_v22  ;;  %v1399_v1 = vmul.f32 %v1378_v24, %v1375_v23  ;;  %v1403_v2 = vmul.f32 %v1378_v24, %v1378_v24 }
  0x43   : > { %2048 = vst [vmem:[#allocation9_spill] sm:$0xff] %v1378_v24  ;;  %2050 = vst [vmem:[#allocation11_spill] sm:$0xff] %v1383_v28  ;;  %v1407_v6 = vmul.f32 %v1378_v24, %v1372_v22  ;;  %v364_v7 = vmul.f32 %v1372_v22, %v1372_v22  ;;  %v370_v8 = vmul.f32 %v1375_v23, %v1375_v23 }
  0x44   : > { %2051 = vst [vmem:[#allocation12_spill] sm:$0xff] %v1386_v29  ;;  %2052 = vst [vmem:[#allocation13_spill] sm:$0xff] %v1389_v31  ;;  %v387_v33 = vmul.f32 %v1323_v55, %v1375_v23  ;;  %v403_v34 = vmul.f32 %v1326_v56, %v1378_v24  ;;  %v418_v35 = vmul.f32 %v1329_v57, %v1372_v22 }
  0x45   : > { %2054 = vst [vmem:[#allocation15_spill] sm:$0xff] %v1395_v0  ;;  %2055 = vst [vmem:[#allocation16_spill] sm:$0xff] %v1399_v1  ;;  %v433_v37 = vmul.f32 %v1332_v58, %v1395_v0  ;;  %v448_v38 = vmul.f32 %v1335_v59, %v1399_v1  ;;  %v463_v40 = vmul.f32 %v1338_v60, %v1403_v2 }
  0x46   : > { %2056 = vst [vmem:[#allocation17_spill] sm:$0xff] %v1403_v2  ;;  %2057 = vst [vmem:[#allocation18_spill] sm:$0xff] %v1407_v6  ;;  %v1425_v41 = vsub.f32 %v364_v7, %v370_v8  ;;  %v394_v43 = vadd.f32 %v1320_v53, %v387_v33  ;;  %v478_v44 = vmul.f32 %v1341_v61, %v1407_v6 }
  0x47   : > { %v1432_v45 = vmul.f32 %v1386_v29, %v1383_v28  ;;  %v1436_v46 = vmul.f32 %v1389_v31, %v1386_v29  ;;  %v1440_v47 = vmul.f32 %v1389_v31, %v1389_v31  ;;  %v1444_v48 = vmul.f32 %v1389_v31, %v1383_v28 }
  0x48   : > { %2058 = vst [vmem:[#allocation19_spill] sm:$0xff] %v1425_v41  ;;  %v365_v49 = vmul.f32 %v1383_v28, %v1383_v28  ;;  %v409_v51 = vadd.f32 %v403_v34, %v394_v43  ;;  %v493_v52 = vmul.f32 %v1344_v62, %v1425_v41  ;;  %v371_v54 = vmul.f32 %v1386_v29, %v1386_v29  ;;  %v1053_v34 = vpop.eup %1052 }
  0x49   : > { %2059 = vst [vmem:[#allocation20_spill] sm:$0xff] %v1432_v45  ;;  %2060 = vst [vmem:[#allocation21_spill] sm:$0xff] %v1436_v46  ;;  %v388_v10 = vmul.f32 %v1323_v55, %v1386_v29  ;;  %v404_v18 = vmul.f32 %v1326_v56, %v1389_v31  ;;  %v419_v7 = vmul.f32 %v1329_v57, %v1383_v28  ;;  %v1467_v17 = vpop.eup %1054 }
  0x4a   : > { %2061 = vst [vmem:[#allocation22_spill] sm:$0xff] %v1440_v47  ;;  %2062 = vst [vmem:[#allocation23_spill] sm:$0xff] %v1444_v48  ;;  %v434_v8 = vmul.f32 %v1332_v58, %v1432_v45  ;;  %v449_v33 = vmul.f32 %v1335_v59, %v1436_v46  ;;  %v424_v43 = vadd.f32 %v418_v35, %v409_v51 }
  0x4b   : > { %v1462_v25 = vsub.f32 %v365_v49, %v371_v54  ;;  %v395_v32 = vadd.f32 %v1320_v53, %v388_v10  ;;  %v464_v29 = vmul.f32 %v1338_v60, %v1440_v47  ;;  %v479_v28 = vmul.f32 %v1341_v61, %v1444_v48  ;;  %v1480_v49 = vpop.eup %1056 }
  0x4c   : > { %v1472_v31 = vmul.f32 %v1051_v50, %v1222_v11  ;;  %v1475_v45 = vmul.f32 %v1051_v50, %v1230_v14  ;;  %v1478_v35 = vmul.f32 %v1051_v50, %v1233_v15  ;;  %v439_v51 = vadd.f32 %v433_v37, %v424_v43 }
  0x4d   : > { %2063 = vst [vmem:[#allocation24_spill] sm:$0xff] %v1462_v25  ;;  %v410_v54 = vadd.f32 %v404_v18, %v395_v32  ;;  %v494_v10 = vmul.f32 %v1344_v62, %v1462_v25  ;;  %v1485_v47 = vmul.f32 %v1053_v34, %v1243_v19 }
  0x4e   : > { %2064 = vst [vmem:[#allocation25_spill] sm:$0xff] %v1472_v31  ;;  %2065 = vst [vmem:[#allocation26_spill] sm:$0xff] %v1475_v45  ;;  %v1489_v11 = vmul.f32 %v1475_v45, %v1472_v31  ;;  %v1493_v14 = vmul.f32 %v1478_v35, %v1475_v45  ;;  %v1497_v15 = vmul.f32 %v1478_v35, %v1478_v35 }
  0x4f   : > { %2066 = vst [vmem:[#allocation27_spill] sm:$0xff] %v1478_v35  ;;  %v1501_v32 = vmul.f32 %v1478_v35, %v1472_v31  ;;  %v454_v37 = vadd.f32 %v448_v38, %v439_v51  ;;  %v425_v50 = vadd.f32 %v419_v7, %v410_v54  ;;  %v366_v19 = vmul.f32 %v1472_v31, %v1472_v31 }
  0x50   : > { %2067 = vst [vmem:[#allocation28_spill] sm:$0xff] %v1489_v11  ;;  %v372_v18 = vmul.f32 %v1475_v45, %v1475_v45  ;;  %v389_v43 = vmul.f32 %v1323_v55, %v1475_v45  ;;  %v405_v25 = vmul.f32 %v1326_v56, %v1478_v35  ;;  %v420_v48 = vmul.f32 %v1329_v57, %v1472_v31 }
  0x51   : > { %v435_v46 = vmul.f32 %v1332_v58, %v1489_v11  ;;  %v469_v38 = vadd.f32 %v463_v40, %v454_v37  ;;  %v440_v7 = vadd.f32 %v434_v8, %v425_v50  ;;  %v450_v54 = vmul.f32 %v1335_v59, %v1493_v14  ;;  %v505_v37 = vld [vmem:[%s1519_s27] sm:$0xff] }
  0x52   : > { %v1521_v51 = vsub.f32 %v366_v19, %v372_v18  ;;  %v396_v35 = vadd.f32 %v1320_v53, %v389_v43  ;;  %v465_v31 = vmul.f32 %v1338_v60, %v1497_v15  ;;  %v480_v11 = vmul.f32 %v1341_v61, %v1501_v32 }
  0x53   : > { %v1531_v45 = vmul.f32 %v1053_v34, %v1246_v20  ;;  %v484_v41 = vadd.f32 %v478_v44, %v469_v38  ;;  %v455_v16 = vadd.f32 %v449_v33, %v440_v7  ;;  %v1536_v8 = vmul.f32 %v1053_v34, %v1249_v21  ;;  %v506_v7 = vld [vmem:[%s1519_s27 + $0x8] sm:$0xff] }
  0x54   : > { %2068 = vst [vmem:[#allocation29_spill] sm:$0xff] %v1521_v51  ;;  %v495_v40 = vmul.f32 %v1344_v62, %v1521_v51  ;;  %v411_v50 = vadd.f32 %v405_v25, %v396_v35  ;;  %v367_v18 = vmul.f32 %v1485_v47, %v1485_v47  ;;  %v421_v38 = vmul.f32 %v1329_v57, %v1485_v47 }
  0x55   : > { %2069 = vst [vmem:[#allocation30_spill] sm:$0xff] %v1531_v45  ;;  %v1541_v19 = vmul.f32 %v1531_v45, %v1485_v47  ;;  %v373_v20 = vmul.f32 %v1531_v45, %v1531_v45  ;;  %v499_v44 = vadd.f32 %v493_v52, %v484_v41  ;;  %v470_v33 = vadd.f32 %v464_v29, %v455_v16 }
  0x56   : > { %v1549_v43 = vmul.f32 %v1536_v8, %v1531_v45  ;;  %v1553_v21 = vmul.f32 %v1536_v8, %v1536_v8  ;;  %v426_v25 = vadd.f32 %v420_v48, %v411_v50  ;;  %v1557_v34 = vmul.f32 %v1536_v8, %v1485_v47 }
  0x57   : > { %v1559_v35 = vsub.f32 %v367_v18, %v373_v20  ;;  %v390_v41 = vmul.f32 %v1323_v55, %v1531_v45  ;;  %v511_v16 = vmul.f32 %v505_v37, %v499_v44  ;;  %v485_v29 = vadd.f32 %v479_v28, %v470_v33 }
  0x58   : > { %v406_v52 = vmul.f32 %v1326_v56, %v1536_v8  ;;  %v441_v48 = vadd.f32 %v435_v46, %v426_v25  ;;  %v436_v51 = vmul.f32 %v1332_v58, %v1541_v19  ;;  %v451_v18 = vmul.f32 %v1335_v59, %v1549_v43 }
  0x59   : > { %v397_v50 = vadd.f32 %v1320_v53, %v390_v41  ;;  %v517_v20 = vmax.f32 %v511_v16, 0.0  ;;  %v500_v45 = vadd.f32 %v494_v10, %v485_v29  ;;  %v466_v28 = vmul.f32 %v1338_v60, %v1553_v21 }
  0x5a   : > { %v481_v37 = vmul.f32 %v1341_v61, %v1557_v34  ;;  %v456_v46 = vadd.f32 %v450_v54, %v441_v48  ;;  %v496_v33 = vmul.f32 %v1344_v62, %v1559_v35  ;;  %v1587_v10 = vmul.f32 %v1467_v17, %v1261_v26 }
  0x5b   : > { %v412_v44 = vadd.f32 %v406_v52, %v397_v50  ;;  %v523_v25 = vmin.f32 %v517_v20, 255.0  ;;  %v512_v41 = vmul.f32 %v506_v7, %v500_v45  ;;  %v1591_v16 = vmul.f32 %v1467_v17, %v1264_v27 }
  0x5c   : > { %2070 = vst [vmem:[#allocation31_spill] sm:$0xff] %v1587_v10  ;;  %v1595_v29 = vmul.f32 %v1467_v17, %v1269_v30  ;;  %v471_v54 = vadd.f32 %v465_v31, %v456_v46  ;;  %v368_v48 = vmul.f32 %v1587_v10, %v1587_v10  ;;  %v422_v26 = vmul.f32 %v1329_v57, %v1587_v10  ;;  %v507_v46 = vld [vmem:[%s1519_s27 + $0x10] sm:$0xff] }
  0x5d   : > { %v427_v52 = vadd.f32 %v421_v38, %v412_v44  ;;  %529 = vst [vmem:[%s1581_s8] sm:$0xff] %v523_v25  ;;  %v518_v50 = vmax.f32 %v512_v41, 0.0  ;;  %v1604_v45 = vmul.f32 %v1591_v16, %v1587_v10  ;;  %v374_v7 = vmul.f32 %v1591_v16, %v1591_v16 }
  0x5e   : > { %2071 = vst [vmem:[#allocation32_spill] sm:$0xff] %v1595_v29  ;;  %v1608_v27 = vmul.f32 %v1595_v29, %v1591_v16  ;;  %v1612_v30 = vmul.f32 %v1595_v29, %v1595_v29  ;;  %v486_v17 = vadd.f32 %v480_v11, %v471_v54  ;;  %v1616_v38 = vmul.f32 %v1595_v29, %v1587_v10 }
  0x5f   : > { %2072 = vst [vmem:[#allocation33_spill] sm:$0xff] %v1604_v45  ;;  %v442_v31 = vadd.f32 %v436_v51, %v427_v52  ;;  %v524_v20 = vmin.f32 %v518_v50, 255.0  ;;  %v391_v44 = vmul.f32 %v1323_v55, %v1591_v16  ;;  %v407_v25 = vmul.f32 %v1326_v56, %v1595_v29 }
  0x60   : > { %v437_v41 = vmul.f32 %v1332_v58, %v1604_v45  ;;  %v501_v11 = vadd.f32 %v495_v40, %v486_v17  ;;  %v1627_v54 = vsub.f32 %v368_v48, %v374_v7  ;;  %v452_v52 = vmul.f32 %v1335_v59, %v1608_v27 }
  0x61   : > { %v457_v51 = vadd.f32 %v451_v18, %v442_v31  ;;  %530 = vst [vmem:[%s1581_s8 + $0x8] sm:$0xff] %v524_v20  ;;  %v398_v50 = vadd.f32 %v1320_v53, %v391_v44  ;;  %v467_v10 = vmul.f32 %v1338_v60, %v1612_v30  ;;  %v482_v29 = vmul.f32 %v1341_v61, %v1616_v38 }
  0x62   : > { %2073 = vst [vmem:[#allocation34_spill] sm:$0xff] %v1627_v54  ;;  %v1639_v45 = vmul.f32 %v1480_v49, %v1279_v36  ;;  %v513_v40 = vmul.f32 %v507_v46, %v501_v11  ;;  %v497_v48 = vmul.f32 %v1344_v62, %v1627_v54  ;;  %v1645_v17 = vmul.f32 %v1480_v49, %v1286_v39 }
  0x63   : > { %v472_v18 = vadd.f32 %v466_v28, %v457_v51  ;;  %v413_v31 = vadd.f32 %v407_v25, %v398_v50  ;;  %v1649_v7 = vmul.f32 %v1480_v49, %v1291_v42  ;;  %v508_v25 = vld [vmem:[%s1519_s27 + $0x18] sm:$0xff] }
  0x64   : > { %2074 = vst [vmem:[#allocation35_spill] sm:$0xff] %v1639_v45  ;;  %v369_v20 = vmul.f32 %v1639_v45, %v1639_v45  ;;  %v423_v36 = vmul.f32 %v1329_v57, %v1639_v45  ;;  %v519_v46 = vmax.f32 %v513_v40, 0.0  ;;  %v1657_v44 = vmul.f32 %v1645_v17, %v1639_v45 }
  0x65   : > { %v487_v28 = vadd.f32 %v481_v37, %v472_v18  ;;  %v375_v39 = vmul.f32 %v1645_v17, %v1645_v17  ;;  %v428_v11 = vadd.f32 %v422_v26, %v413_v31  ;;  %v1664_v42 = vmul.f32 %v1649_v7, %v1645_v17 }
  0x66   : > { %v1668_v49 = vmul.f32 %v1649_v7, %v1649_v7  ;;  %v1672_v57 = vmul.f32 %v1649_v7, %v1639_v45  ;;  %v525_v37 = vmin.f32 %v519_v46, 255.0  ;;  %v392_v40 = vmul.f32 %v1323_v55, %v1645_v17 }
  0x67   : > { %v502_v51 = vadd.f32 %v496_v33, %v487_v28  ;;  %v1674_v50 = vsub.f32 %v369_v20, %v375_v39  ;;  %v443_v26 = vadd.f32 %v437_v41, %v428_v11  ;;  %v408_v18 = vmul.f32 %v1326_v56, %v1649_v7  ;;  %v2078_v11 = vld [vmem:[#allocation5_spill] sm:$0xff] }
  0x68   : > { %2075 = vst [vmem:[#allocation36_spill] sm:$0xff] %v1668_v49  ;;  %2076 = vst [vmem:[#allocation37_spill] sm:$0xff] %v1672_v57  ;;  %v438_v31 = vmul.f32 %v1332_v58, %v1657_v44  ;;  %v453_v54 = vmul.f32 %v1335_v59, %v1664_v42  ;;  %v399_v46 = vadd.f32 %v1320_v53, %v392_v40  ;;  %v2080_v40 = vld [vmem:[#allocation6_spill] sm:$0xff] }
  0x69   : > { %2077 = vst [vmem:[#allocation38_spill] sm:$0xff] %v1674_v50  ;;  %531 = vst [vmem:[%s1581_s8 + $0x10] sm:$0xff] %v525_v37  ;;  %v514_v45 = vmul.f32 %v508_v25, %v502_v51  ;;  %v468_v33 = vmul.f32 %v1338_v60, %v1668_v49  ;;  %v483_v55 = vmul.f32 %v1341_v61, %v1672_v57  ;;  %v2079_v51 = vld [vmem:[#allocation19_spill] sm:$0xff] }
  0x6a   : > { %v458_v41 = vadd.f32 %v452_v52, %v443_v26  ;;  %v498_v56 = vmul.f32 %v1344_v62, %v1674_v50  ;;  %v540_v58 = vmul.f32 %v1347_v63, %v1375_v23  ;;  %v556_v59 = vmul.f32 %v1353_v4, %v1378_v24  ;;  %v2089_v24 = vld [vmem:[#allocation26_spill] sm:$0xff] }
  0x6b   : > { %v520_v20 = vmax.f32 %v514_v45, 0.0  ;;  %v414_v28 = vadd.f32 %v408_v18, %v399_v46  ;;  %v571_v53 = vmul.f32 %v1356_v5, %v1372_v22  ;;  %v586_v60 = vmul.f32 %v1359_v9, %v1395_v0  ;;  %v2081_v0 = vld [vmem:[#allocation12_spill] sm:$0xff] }
  0x6c   : > { %v473_v61 = vadd.f32 %v467_v10, %v458_v41  ;;  %v547_v52 = vadd.f32 %v1350_v3, %v540_v58  ;;  %v601_v62 = vmul.f32 %v1362_v12, %v1399_v1  ;;  %v616_v39 = vmul.f32 %v1365_v13, %v1403_v2  ;;  %v2082_v41 = vld [vmem:[#allocation13_spill] sm:$0xff]  ;;  %v2083_v2 = vld [vmem:[#allocation11_spill] sm:$0xff] }
  0x6d   : > { %v526_v25 = vmin.f32 %v520_v20, 255.0  ;;  %v429_v45 = vadd.f32 %v423_v36, %v414_v28  ;;  %v631_v37 = vmul.f32 %v2078_v11, %v1407_v6  ;;  %v646_v26 = vmul.f32 %v2080_v40, %v2079_v51  ;;  %v509_v1 = vld [vmem:[%s1519_s27 + $0x20] sm:$0xff]  ;;  %v2084_v20 = vld [vmem:[#allocation20_spill] sm:$0xff] }
  0x6e   : > { %v488_v18 = vadd.f32 %v482_v29, %v473_v61  ;;  %v562_v46 = vadd.f32 %v556_v59, %v547_v52  ;;  %v541_v10 = vmul.f32 %v1347_v63, %v2081_v0  ;;  %v557_v58 = vmul.f32 %v1353_v4, %v2082_v41  ;;  %v2085_v6 = vld [vmem:[#allocation21_spill] sm:$0xff]  ;;  %v2086_v52 = vld [vmem:[#allocation22_spill] sm:$0xff] }
  0x6f   : > { %532 = vst [vmem:[%s1581_s8 + $0x18] sm:$0xff] %v526_v25  ;;  %v444_v22 = vadd.f32 %v438_v31, %v429_v45  ;;  %v572_v36 = vmul.f32 %v1356_v5, %v2083_v2  ;;  %v587_v28 = vmul.f32 %v1359_v9, %v2084_v20  ;;  %v602_v51 = vmul.f32 %v1362_v12, %v2085_v6  ;;  %v2087_v25 = vld [vmem:[#allocation23_spill] sm:$0xff]  ;;  %v2088_v45 = vld [vmem:[#allocation24_spill] sm:$0xff] }
  0x70   : > { %v503_v29 = vadd.f32 %v497_v48, %v488_v18  ;;  %v577_v59 = vadd.f32 %v571_v53, %v562_v46  ;;  %v548_v61 = vadd.f32 %v1350_v3, %v541_v10  ;;  %v617_v0 = vmul.f32 %v1365_v13, %v2086_v52  ;;  %v2090_v53 = vld [vmem:[#allocation27_spill] sm:$0xff] }
  0x71   : > { %v459_v41 = vadd.f32 %v453_v54, %v444_v22  ;;  %v632_v31 = vmul.f32 %v2078_v11, %v2087_v25  ;;  %v647_v2 = vmul.f32 %v2080_v40, %v2088_v45  ;;  %v542_v20 = vmul.f32 %v1347_v63, %v2089_v24  ;;  %v2091_v22 = vld [vmem:[#allocation25_spill] sm:$0xff]  ;;  %v2092_v25 = vld [vmem:[#allocation28_spill] sm:$0xff] }
  0x72   : > { %v515_v23 = vmul.f32 %v509_v1, %v503_v29  ;;  %v592_v50 = vadd.f32 %v586_v60, %v577_v59  ;;  %v563_v48 = vadd.f32 %v557_v58, %v548_v61  ;;  %v558_v18 = vmul.f32 %v1353_v4, %v2090_v53  ;;  %v510_v29 = vld [vmem:[%s1519_s27 + $0x28] sm:$0xff] }
  0x73   : > { %v474_v46 = vadd.f32 %v468_v33, %v459_v41  ;;  %v549_v10 = vadd.f32 %v1350_v3, %v542_v20  ;;  %v573_v54 = vmul.f32 %v1356_v5, %v2091_v22  ;;  %v588_v52 = vmul.f32 %v1359_v9, %v2092_v25 }
  0x74   : > { %v521_v45 = vmax.f32 %v515_v23, 0.0  ;;  %v607_v6 = vadd.f32 %v601_v62, %v592_v50  ;;  %v578_v24 = vadd.f32 %v572_v36, %v563_v48  ;;  %v603_v1 = vmul.f32 %v1362_v12, %v1493_v14  ;;  %v2093_v23 = vld [vmem:[#allocation29_spill] sm:$0xff]  ;;  %v2094_v48 = vld [vmem:[#allocation30_spill] sm:$0xff] }
  0x75   : > { %v489_v60 = vadd.f32 %v483_v55, %v474_v46  ;;  %v564_v58 = vadd.f32 %v558_v18, %v549_v10  ;;  %v618_v33 = vmul.f32 %v1365_v13, %v1497_v15  ;;  %v633_v41 = vmul.f32 %v2078_v11, %v1501_v32 }
  0x76   : > { %v527_v20 = vmin.f32 %v521_v45, 255.0  ;;  %v622_v59 = vadd.f32 %v616_v39, %v607_v6  ;;  %v593_v61 = vadd.f32 %v587_v28, %v578_v24  ;;  %v648_v50 = vmul.f32 %v2080_v40, %v2093_v23  ;;  %v984_v39 = vld [vmem:[%s1519_s27 + $0x30] sm:$0xff] }
  0x77   : > { %v504_v62 = vadd.f32 %v498_v56, %v489_v60  ;;  %v579_v36 = vadd.f32 %v573_v54, %v564_v58  ;;  %v543_v55 = vmul.f32 %v1347_v63, %v2094_v48  ;;  %v559_v18 = vmul.f32 %v1353_v4, %v1536_v8 }
  0x78   : > { %533 = vst [vmem:[%s1581_s8 + $0x20] sm:$0xff] %v527_v20  ;;  %v637_v46 = vadd.f32 %v631_v37, %v622_v59  ;;  %v608_v10 = vadd.f32 %v602_v51, %v593_v61  ;;  %v574_v45 = vmul.f32 %v1356_v5, %v1485_v47  ;;  %v589_v24 = vmul.f32 %v1359_v9, %v1541_v19 }
  0x79   : > { %v516_v6 = vmul.f32 %v510_v29, %v504_v62  ;;  %v594_v56 = vadd.f32 %v588_v52, %v579_v36  ;;  %v550_v28 = vadd.f32 %v1350_v3, %v543_v55  ;;  %v604_v54 = vmul.f32 %v1362_v12, %v1549_v43 }
  0x7a   : > { %v652_v60 = vadd.f32 %v646_v26, %v637_v46  ;;  %v623_v37 = vadd.f32 %v617_v0, %v608_v10  ;;  %v619_v51 = vmul.f32 %v1365_v13, %v1553_v21  ;;  %v634_v58 = vmul.f32 %v2078_v11, %v1557_v34  ;;  %v2095_v26 = vld [vmem:[#allocation32_spill] sm:$0xff]  ;;  %v2096_v10 = vld [vmem:[#allocation31_spill] sm:$0xff] }
  0x7b   : > { %v522_v20 = vmax.f32 %v516_v6, 0.0  ;;  %v609_v29 = vadd.f32 %v603_v1, %v594_v56  ;;  %v565_v59 = vadd.f32 %v559_v18, %v550_v28  ;;  %v1765_v52 = vmul.f32 %v2080_v40, %v1559_v35  ;;  %v985_v46 = vld [vmem:[%s1519_s27 + $0x38] sm:$0xff]  ;;  %v2097_v28 = vld [vmem:[#allocation33_spill] sm:$0xff] }
  0x7c   : > { %v665_v61 = vmul.f32 %v984_v39, %v652_v60  ;;  %v638_v62 = vadd.f32 %v632_v31, %v623_v37  ;;  %v544_v0 = vmul.f32 %v1347_v63, %v1591_v16  ;;  %v560_v36 = vmul.f32 %v1353_v4, %v2095_v26 }
  0x7d   : > { %v528_v55 = vmin.f32 %v522_v20, 255.0  ;;  %v624_v1 = vadd.f32 %v618_v33, %v609_v29  ;;  %v580_v18 = vadd.f32 %v574_v45, %v565_v59  ;;  %v575_v6 = vmul.f32 %v1356_v5, %v2096_v10  ;;  %v986_v59 = vld [vmem:[%s1519_s27 + $0x40] sm:$0xff] }
  0x7e   : > { %v671_v39 = vmax.f32 %v665_v61, 0.0  ;;  %v653_v31 = vadd.f32 %v647_v2, %v638_v62  ;;  %v551_v56 = vadd.f32 %v1350_v3, %v544_v0  ;;  %v590_v60 = vmul.f32 %v1359_v9, %v2097_v28  ;;  %v2098_v0 = vld [vmem:[#allocation34_spill] sm:$0xff] }
  0x7f   : > { %534 = vst [vmem:[%s1581_s8 + $0x28] sm:$0xff] %v528_v55  ;;  %v639_v33 = vadd.f32 %v633_v41, %v624_v1  ;;  %v595_v37 = vadd.f32 %v589_v24, %v580_v18  ;;  %v605_v45 = vmul.f32 %v1362_v12, %v1608_v27  ;;  %v620_v20 = vmul.f32 %v1365_v13, %v1612_v30 }
  0x80   : > { %v677_v2 = vmin.f32 %v671_v39, 255.0  ;;  %v666_v29 = vmul.f32 %v985_v46, %v653_v31  ;;  %v566_v61 = vadd.f32 %v560_v36, %v551_v56  ;;  %v635_v62 = vmul.f32 %v2078_v11, %v1616_v38  ;;  %v2099_v39 = vld [vmem:[#allocation35_spill] sm:$0xff] }
  0x81   : > { %v654_v41 = vadd.f32 %v648_v50, %v639_v33  ;;  %v610_v24 = vadd.f32 %v604_v54, %v595_v37  ;;  %v650_v55 = vmul.f32 %v2080_v40, %v2098_v0  ;;  %v545_v1 = vmul.f32 %v1347_v63, %v1645_v17 }
  0x82   : > { %990 = vst [vmem:[%s1581_s8 + $0x30] sm:$0xff] %v677_v2  ;;  %v672_v46 = vmax.f32 %v666_v29, 0.0  ;;  %v581_v36 = vadd.f32 %v575_v6, %v566_v61  ;;  %v561_v18 = vmul.f32 %v1353_v4, %v1649_v7  ;;  %v576_v31 = vmul.f32 %v1356_v5, %v2099_v39  ;;  %v987_v2 = vld [vmem:[%s1519_s27 + $0x48] sm:$0xff] }
  0x83   : > { %v667_v50 = vmul.f32 %v986_v59, %v654_v41  ;;  %v625_v54 = vadd.f32 %v619_v51, %v610_v24  ;;  %v552_v63 = vadd.f32 %v1350_v3, %v545_v1  ;;  %v591_v56 = vmul.f32 %v1359_v9, %v1657_v44  ;;  %v2100_v29 = vld [vmem:[#allocation38_spill] sm:$0xff]  ;;  %v2101_v59 = vld [vmem:[#allocation8_spill] sm:$0xff] }
  0x84   : > { %v678_v6 = vmin.f32 %v672_v46, 255.0  ;;  %v596_v33 = vadd.f32 %v590_v60, %v581_v36  ;;  %v606_v4 = vmul.f32 %v1362_v12, %v1664_v42  ;;  %v621_v5 = vmul.f32 %v1365_v13, %v1668_v49  ;;  %v2102_v61 = vld [vmem:[#allocation14_spill] sm:$0xff]  ;;  %v2103_v46 = vld [vmem:[#allocation9_spill] sm:$0xff] }
  0x85   : > { %v673_v37 = vmax.f32 %v667_v50, 0.0  ;;  %v640_v51 = vadd.f32 %v634_v58, %v625_v54  ;;  %v567_v3 = vadd.f32 %v561_v18, %v552_v63  ;;  %v636_v9 = vmul.f32 %v2078_v11, %v1672_v57 }
  0x86   : > { %991 = vst [vmem:[%s1581_s8 + $0x38] sm:$0xff] %v678_v6  ;;  %v611_v60 = vadd.f32 %v605_v45, %v596_v33  ;;  %v651_v12 = vmul.f32 %v2080_v40, %v2100_v29  ;;  %v695_v13 = vmul.f32 %v2102_v61, %v2101_v59  ;;  %v1831_v41 = vstv %s1780_s17  ;;  %v2104_v45 = vld [vmem:[#allocation10_spill] sm:$0xff]  ;;  %v2105_v6 = vld [vmem:[#allocation7_spill] sm:$0xff]  ;;  %v2111_v29 = vld [vmem:[#allocation12_spill] sm:$0xff] }
  0x87   : > { %v679_v24 = vmin.f32 %v673_v37, 255.0  ;;  %v655_v58 = vadd.f32 %v1765_v52, %v640_v51  ;;  %v582_v1 = vadd.f32 %v576_v31, %v567_v3  ;;  %v711_v11 = vmul.f32 %v1831_v41, %v2103_v46  ;;  %v2106_v31 = vld [vmem:[#allocation15_spill] sm:$0xff] }
  0x88   : > { %v626_v36 = vadd.f32 %v620_v20, %v611_v60  ;;  %v702_v18 = vadd.f32 %v2104_v45, %v695_v13  ;;  %v1838_v50 = vstv %s1788_s21  ;;  %v1841_v40 = vstv %s1794_s29  ;;  %v988_v59 = vld [vmem:[%s1519_s27 + $0x50] sm:$0xff] }
  0x89   : > { %992 = vst [vmem:[%s1581_s8 + $0x40] sm:$0xff] %v679_v24  ;;  %v668_v54 = vmul.f32 %v987_v2, %v655_v58  ;;  %v597_v63 = vadd.f32 %v591_v56, %v582_v1  ;;  %v726_v52 = vmul.f32 %v1838_v50, %v2105_v6  ;;  %v741_v33 = vmul.f32 %v1841_v40, %v2106_v31  ;;  %v2107_v24 = vld [vmem:[#allocation16_spill] sm:$0xff]  ;;  %v2108_v56 = vld [vmem:[#allocation17_spill] sm:$0xff]  ;;  %v2110_v31 = vld [vmem:[#allocation19_spill] sm:$0xff] }
  0x8a   : > { %v641_v37 = vadd.f32 %v635_v62, %v626_v36  ;;  %v717_v51 = vadd.f32 %v711_v11, %v702_v18  ;;  %v1849_v20 = vstv %s1801_s11  ;;  %v1852_v3 = vstv %s1809_s20  ;;  %v2109_v18 = vld [vmem:[#allocation18_spill] sm:$0xff] }
  0x8b   : > { %v674_v60 = vmax.f32 %v668_v54, 0.0  ;;  %v612_v13 = vadd.f32 %v606_v4, %v597_v63  ;;  %v756_v2 = vmul.f32 %v1849_v20, %v2107_v24  ;;  %v771_v58 = vmul.f32 %v1852_v3, %v2108_v56 }
  0x8c   : > { %v656_v1 = vadd.f32 %v650_v55, %v641_v37  ;;  %v732_v46 = vadd.f32 %v726_v52, %v717_v51  ;;  %v1860_v6 = vstv %s1814_s24  ;;  %v1863_v62 = vstv %s1820_s22  ;;  %v2112_v55 = vld [vmem:[#allocation13_spill] sm:$0xff]  ;;  %v2113_v51 = vld [vmem:[#allocation11_spill] sm:$0xff] }
  0x8d   : > { %v680_v11 = vmin.f32 %v674_v60, 255.0  ;;  %v627_v36 = vadd.f32 %v621_v5, %v612_v13  ;;  %v786_v54 = vmul.f32 %v1860_v6, %v2109_v18  ;;  %v801_v4 = vmul.f32 %v1863_v62, %v2110_v31  ;;  %v2114_v5 = vld [vmem:[#allocation20_spill] sm:$0xff]  ;;  %v2115_v18 = vld [vmem:[#allocation21_spill] sm:$0xff] }
  0x8e   : > { %v669_v63 = vmul.f32 %v988_v59, %v656_v1  ;;  %v747_v24 = vadd.f32 %v741_v33, %v732_v46  ;;  %v696_v56 = vmul.f32 %v2102_v61, %v2111_v29  ;;  %v712_v52 = vmul.f32 %v1831_v41, %v2112_v55  ;;  %v989_v59 = vld [vmem:[%s1519_s27 + $0x58] sm:$0xff]  ;;  %v2116_v1 = vld [vmem:[#allocation22_spill] sm:$0xff] }
  0x8f   : > { %993 = vst [vmem:[%s1581_s8 + $0x48] sm:$0xff] %v680_v11  ;;  %v642_v37 = vadd.f32 %v636_v9, %v627_v36  ;;  %v727_v60 = vmul.f32 %v1838_v50, %v2113_v51  ;;  %v742_v13 = vmul.f32 %v1841_v40, %v2114_v5  ;;  %v757_v57 = vmul.f32 %v1849_v20, %v2115_v18  ;;  %v2117_v9 = vld [vmem:[#allocation23_spill] sm:$0xff]  ;;  %v2118_v55 = vld [vmem:[#allocation24_spill] sm:$0xff]  ;;  %v2119_v5 = vld [vmem:[#allocation26_spill] sm:$0xff] }
  0x90   : > { %v675_v31 = vmax.f32 %v669_v63, 0.0  ;;  %v762_v33 = vadd.f32 %v756_v2, %v747_v24  ;;  %v703_v29 = vadd.f32 %v2104_v45, %v696_v56  ;;  %v772_v46 = vmul.f32 %v1852_v3, %v2116_v1 }
  0x91   : > { %v657_v11 = vadd.f32 %v651_v12, %v642_v37  ;;  %v787_v36 = vmul.f32 %v1860_v6, %v2117_v9  ;;  %v802_v51 = vmul.f32 %v1863_v62, %v2118_v55  ;;  %v697_v18 = vmul.f32 %v2102_v61, %v2119_v5 }
  0x92   : > { %v681_v63 = vmin.f32 %v675_v31, 255.0  ;;  %v777_v49 = vadd.f32 %v771_v58, %v762_v33  ;;  %v718_v0 = vadd.f32 %v712_v52, %v703_v29  ;;  %v713_v2 = vmul.f32 %v1831_v41, %v2090_v53  ;;  %v996_v53 = vld [vmem:[%s1519_s27 + $0x60] sm:$0xff] }
  0x93   : > { %v670_v24 = vmul.f32 %v989_v59, %v657_v11  ;;  %v704_v56 = vadd.f32 %v2104_v45, %v697_v18  ;;  %v728_v12 = vmul.f32 %v1838_v50, %v2091_v22  ;;  %v743_v37 = vmul.f32 %v1841_v40, %v2092_v25 }
  0x94   : > { %994 = vst [vmem:[%s1581_s8 + $0x50] sm:$0xff] %v681_v63  ;;  %v792_v1 = vadd.f32 %v786_v54, %v777_v49  ;;  %v733_v9 = vadd.f32 %v727_v60, %v718_v0  ;;  %v758_v31 = vmul.f32 %v1849_v20, %v1493_v14  ;;  %v773_v58 = vmul.f32 %v1852_v3, %v1497_v15 }
  0x95   : > { %v676_v52 = vmax.f32 %v670_v24, 0.0  ;;  %v719_v59 = vadd.f32 %v713_v2, %v704_v56  ;;  %v788_v33 = vmul.f32 %v1860_v6, %v1501_v32  ;;  %v803_v22 = vmul.f32 %v1863_v62, %v2093_v23 }
  0x96   : > { %v807_v25 = vadd.f32 %v801_v4, %v792_v1  ;;  %v748_v29 = vadd.f32 %v742_v13, %v733_v9  ;;  %v698_v49 = vmul.f32 %v2102_v61, %v2094_v48  ;;  %v714_v14 = vmul.f32 %v1831_v41, %v1536_v8  ;;  %v998_v9 = vld [vmem:[%s1519_s27 + $0x70] sm:$0xff] }
  0x97   : > { %v682_v0 = vmin.f32 %v676_v52, 255.0  ;;  %v734_v15 = vadd.f32 %v728_v12, %v719_v59  ;;  %v729_v54 = vmul.f32 %v1838_v50, %v1485_v47  ;;  %v744_v60 = vmul.f32 %v1841_v40, %v1541_v19 }
  0x98   : > { %v820_v32 = vmul.f32 %v996_v53, %v807_v25  ;;  %v763_v11 = vadd.f32 %v757_v57, %v748_v29  ;;  %v705_v23 = vadd.f32 %v2104_v45, %v698_v49  ;;  %v759_v4 = vmul.f32 %v1849_v20, %v1549_v43 }
  0x99   : > { %995 = vst [vmem:[%s1581_s8 + $0x58] sm:$0xff] %v682_v0  ;;  %v749_v48 = vadd.f32 %v743_v37, %v734_v15  ;;  %v774_v8 = vmul.f32 %v1852_v3, %v1553_v21  ;;  %v789_v47 = vmul.f32 %v1860_v6, %v1557_v34  ;;  %v804_v19 = vmul.f32 %v1863_v62, %v1559_v35  ;;  %v997_v35 = vld [vmem:[%s1519_s27 + $0x68] sm:$0xff] }
  0x9a   : > { %v826_v13 = vmax.f32 %v820_v32, 0.0  ;;  %v778_v57 = vadd.f32 %v772_v46, %v763_v11  ;;  %v720_v55 = vadd.f32 %v714_v14, %v705_v23  ;;  %v699_v5 = vmul.f32 %v2102_v61, %v1591_v16  ;;  %v2120_v15 = vld [vmem:[#allocation34_spill] sm:$0xff]  ;;  %v1000_v23 = vld [vmem:[%s1519_s27 + $0x80] sm:$0xff] }
  0x9b   : > { %v764_v43 = vadd.f32 %v758_v31, %v749_v48  ;;  %v715_v18 = vmul.f32 %v1831_v41, %v2095_v26  ;;  %v730_v21 = vmul.f32 %v1838_v50, %v2096_v10  ;;  %v745_v16 = vmul.f32 %v1841_v40, %v2097_v28 }
  0x9c   : > { %v832_v63 = vmin.f32 %v826_v13, 255.0  ;;  %v793_v2 = vadd.f32 %v787_v36, %v778_v57  ;;  %v735_v34 = vadd.f32 %v729_v54, %v720_v55  ;;  %v706_v24 = vadd.f32 %v2104_v45, %v699_v5 }
  0x9d   : > { %v779_v56 = vadd.f32 %v773_v58, %v764_v43  ;;  %v700_v26 = vmul.f32 %v2102_v61, %v1645_v17  ;;  %v716_v10 = vmul.f32 %v1831_v41, %v1649_v7  ;;  %v760_v58 = vmul.f32 %v1849_v20, %v1608_v27  ;;  %v1001_v43 = vld [vmem:[%s1519_s27 + $0x88] sm:$0xff] }
  0x9e   : > { %1002 = vst [vmem:[%s1581_s8 + $0x60] sm:$0xff] %v832_v63  ;;  %v808_v46 = vadd.f32 %v802_v51, %v793_v2  ;;  %v750_v12 = vadd.f32 %v744_v60, %v735_v34  ;;  %v721_v37 = vadd.f32 %v715_v18, %v706_v24  ;;  %v731_v28 = vmul.f32 %v1838_v50, %v2099_v39  ;;  %v999_v50 = vld [vmem:[%s1519_s27 + $0x78] sm:$0xff] }
  0x9f   : > { %v794_v1 = vadd.f32 %v788_v33, %v779_v56  ;;  %v707_v53 = vadd.f32 %v2104_v45, %v700_v26  ;;  %v775_v7 = vmul.f32 %v1852_v3, %v1612_v30  ;;  %v746_v25 = vmul.f32 %v1841_v40, %v1657_v44  ;;  %v2121_v60 = vld [vmem:[#allocation36_spill] sm:$0xff] }
  0xa0   : > { %v821_v36 = vmul.f32 %v997_v35, %v808_v46  ;;  %v765_v31 = vadd.f32 %v759_v4, %v750_v12  ;;  %v736_v52 = vadd.f32 %v730_v21, %v721_v37  ;;  %v790_v39 = vmul.f32 %v1860_v6, %v1616_v38 }
  0xa1   : > { %v809_v51 = vadd.f32 %v803_v22, %v794_v1  ;;  %v722_v33 = vadd.f32 %v716_v10, %v707_v53  ;;  %v761_v14 = vmul.f32 %v1849_v20, %v1664_v42  ;;  %v805_v44 = vmul.f32 %v1863_v62, %v2120_v15  ;;  %v2122_v42 = vld [vmem:[#allocation37_spill] sm:$0xff] }
  0xa2   : > { %v827_v59 = vmax.f32 %v821_v36, 0.0  ;;  %v780_v17 = vadd.f32 %v774_v8, %v765_v31  ;;  %v751_v61 = vadd.f32 %v745_v16, %v736_v52  ;;  %v776_v32 = vmul.f32 %v1852_v3, %v2121_v60 }
  0xa3   : > { %v822_v41 = vmul.f32 %v998_v9, %v809_v51  ;;  %v737_v49 = vadd.f32 %v731_v28, %v722_v33  ;;  %v791_v20 = vmul.f32 %v1860_v6, %v2122_v42 }
  0xa4   : > { %v833_v27 = vmin.f32 %v827_v59, 255.0  ;;  %v795_v29 = vadd.f32 %v789_v47, %v780_v17  ;;  %v766_v22 = vadd.f32 %v760_v58, %v751_v61 }
  0xa5   : > { %v828_v45 = vmax.f32 %v822_v41, 0.0  ;;  %v752_v54 = vadd.f32 %v746_v25, %v737_v49 }
  0xa6   : > { %1003 = vst [vmem:[%s1581_s8 + $0x68] sm:$0xff] %v833_v27  ;;  %v810_v30 = vadd.f32 %v804_v19, %v795_v29  ;;  %v781_v0 = vadd.f32 %v775_v7, %v766_v22  ;;  %v2123_v19 = vld [vmem:[#allocation38_spill] sm:$0xff] }
  0xa7   : > { %v834_v40 = vmin.f32 %v828_v45, 255.0  ;;  %v767_v4 = vadd.f32 %v761_v14, %v752_v54  ;;  %v806_v13 = vmul.f32 %v1863_v62, %v2123_v19 }
  0xa8   : > { %v823_v38 = vmul.f32 %v999_v50, %v810_v30  ;;  %v796_v11 = vadd.f32 %v790_v39, %v781_v0 }
  0xa9   : > { %1004 = vst [vmem:[%s1581_s8 + $0x70] sm:$0xff] %v834_v40  ;;  %v782_v47 = vadd.f32 %v776_v32, %v767_v4 }
  0xaa   : > { %v829_v48 = vmax.f32 %v823_v38, 0.0  ;;  %v811_v8 = vadd.f32 %v805_v44, %v796_v11 }
  0xab   : > { %v797_v3 = vadd.f32 %v791_v20, %v782_v47 }
  0xac   : > { %v835_v57 = vmin.f32 %v829_v48, 255.0  ;;  %v824_v55 = vmul.f32 %v1000_v23, %v811_v8 }
  0xad   : > { %v812_v18 = vadd.f32 %v806_v13, %v797_v3 }
  0xae   : > { %1005 = vst [vmem:[%s1581_s8 + $0x78] sm:$0xff] %v835_v57  ;;  %v830_v5 = vmax.f32 %v824_v55, 0.0 }
  0xaf   : > { %v825_v63 = vmul.f32 %v1001_v43, %v812_v18 }
  0xb0   : > { %v836_v21 = vmin.f32 %v830_v5, 255.0 }
  0xb1   : > { %v831_v2 = vmax.f32 %v825_v63, 0.0 }
  0xb2   : > { %1006 = vst [vmem:[%s1581_s8 + $0x80] sm:$0xff] %v836_v21 }
  0xb3   : > { %v837_v34 = vmin.f32 %v831_v2, 255.0 }
  0xb5   : > { %1007 = vst [vmem:[%s1581_s8 + $0x88] sm:$0xff] %v837_v34 }
  0xb6 PF: > { %s14_s14 = sadd.s32 1, %s1099_s14   ;;  %s2124_s12 = smov %s1095_s13 }
  0xb7   : > { %p11_p2 = scmp.ge.s32.totalorder %s14_s14, 4   ;;  %s2125_s13 = smov %s2127_s16 }
  0xb9   :  { %13 = sbr.rel (!%p11_p2) target bundleno = 5 (0x5), region = 76 }
  0xbe   :  { %875 = vsyncpa [#allocation3], 1 }
  0xbf   :  { %877 = vsyncpa [#allocation3 + $0x1], 1 }

</bundles_post_ra>
